<compile_context>
chip_gen: v5e
topology: v5e:2x2
jax: 0.10.0
libtpu: 0.0.40
codegen_flags: <defaults>
</compile_context>

<pallas_src>
import functools
import math

import jax
import jax.numpy as jnp
from jax.experimental import pallas as pl
from jax.experimental.pallas import tpu as pltpu


def _self_attention_kernel(x_ref, wqkv_ref, bqkv_ref, wf_ref, bf_ref, *rest,
                           n_heads, seq_len, q_tile, dim_k, dim_v,
                           has_mask, mxu_dtype):
    """Grid = (batch, q_tiles).  One step = one batch element x one query tile.

    x_ref    : (1, S, Dk)         tokens of this batch element (resident over q)
    wqkv_ref : (Dk, 2*Dk + Dv)    fused Q|K|V weights (Q pre-scaled by 1/sqrt(hd))
    bqkv_ref : (1, 2*Dk + Dv)     fused biases (f32)
    wf_ref   : (H, hd_v, Dv_pad)  final projection split per head, lane-padded
    bf_ref   : (1, Dv_pad)        final bias (f32, zero in padded lanes)
    mask_ref : (tq, S)            multiplicative mask tile (applied AFTER softmax)
    o_ref    : (1, tq, Dv_pad)    lane-dense output tile
    q_sc/k_sc/v_sc : (H, S, hd)   per-head projections, persist across q tiles
    """
    if has_mask:
        mask_ref, o_ref, q_sc, k_sc, v_sc = rest
    else:
        o_ref, q_sc, k_sc, v_sc = rest

    H, S, tq = n_heads, seq_len, q_tile
    Dk, Dv = dim_k, dim_v
    hd_k = Dk // H
    hd_v = Dv // H

    # ---- Fused QKV projection: once per batch element (first query tile). ----
    @pl.when(pl.program_id(1) == 0)
    def _():
        xf = x_ref[0].astype(mxu_dtype)                               # (S, Dk)
        qkv = jnp.dot(xf, wqkv_ref[...],
                      preferred_element_type=jnp.float32) + bqkv_ref[...]
        # Head split: static lane slices written straight into scratch.  No
        # concatenates, no per-(batch, head) temporaries; the relayout cost is
        # paid once per batch element and amortized over the q-tile loop.
        for h in range(H):
            q_sc[h] = qkv[:, h * hd_k:(h + 1) * hd_k].astype(mxu_dtype)
            k_sc[h] = qkv[:, Dk + h * hd_k:Dk + (h + 1) * hd_k].astype(mxu_dtype)
            v_sc[h] = qkv[:, 2 * Dk + h * hd_v:2 * Dk + (h + 1) * hd_v].astype(mxu_dtype)

    qi = pl.program_id(1)
    row0 = pl.multiple_of(qi * tq, tq)

    qh = q_sc[:, pl.ds(row0, tq), :]                                  # (H, tq, hd_k)
    kh = k_sc[...]                                                    # (H, S,  hd_k)
    vh = v_sc[...]                                                    # (H, S,  hd_v)

    # Scores for this query tile vs. all keys; 1/sqrt(hd) already folded into Wq.
    s = jnp.einsum("hqd,hkd->hqk", qh, kh,
                   preferred_element_type=jnp.float32)                # (H, tq, S) f32

    # Numerically stable softmax; the reciprocal runs on the EUP slot.
    # (approx recip has ~2^-12 relative error; use an exact divide if bit
    #  parity with the PyTorch module is required.)
    s = s - jnp.max(s, axis=-1, keepdims=True)
    p = jnp.exp(s)
    denom = jnp.sum(p, axis=-1, keepdims=True)
    p = p * pl.reciprocal(denom, approx=True)

    if has_mask:
        # Multiplicative mask applied AFTER softmax (matches the PyTorch module;
        # rows are intentionally not renormalized).
        p = p * mask_ref[...].astype(jnp.float32)[None, :, :]

    pv = jnp.einsum("hqk,hkd->hqd", p.astype(mxu_dtype), vh,
                    preferred_element_type=jnp.float32)               # (H, tq, hd_v)

    # Head merge folded into the final projection:
    #   concat_h(pv_h) @ Wf.T  ==  sum_h  pv_h @ Wf.T[h*hd_v:(h+1)*hd_v, :]
    # -> no transpose / concatenate needed in the kernel.
    pvc = pv.astype(mxu_dtype)
    acc = jnp.zeros((tq, bf_ref.shape[-1]), jnp.float32)
    for h in range(H):
        acc += jnp.dot(pvc[h], wf_ref[h], preferred_element_type=jnp.float32)
    out = acc + bf_ref[...]

    o_ref[0] = out.astype(o_ref.dtype)


def _default_mxu_dtype():
    # bf16 MXU operands (with f32 accumulation) on v6e/v7x-class chips; f32
    # elsewhere (v5e's VPU/EUP have no bf16 and its MXU gain is smaller).
    try:
        kind = jax.devices()[0].device_kind.lower()
    except Exception:
        return jnp.float32
    if "v6" in kind or "v7" in kind or "trillium" in kind:
        return jnp.bfloat16
    return jnp.float32


def _padded_vmem_bytes(shape, dtype):
    """VMEM footprint of one buffer, including (sublane, lane) tile padding."""
    itemsize = jnp.dtype(dtype).itemsize
    shape = (1,) * max(0, 2 - len(shape)) + tuple(shape)
    lead = 1
    for d in shape[:-2]:
        lead *= d
    sub = 8 * max(1, 4 // itemsize)          # 8 rows (f32) / 16 rows (bf16) per tile
    rows = -(-shape[-2] // sub) * sub
    cols = -(-shape[-1] // 128) * 128
    return lead * rows * cols * itemsize


def self_attention_forward(x, params, n_heads, mask=None, *,
                           q_tile=None, mxu_dtype=None):
    """Forward pass of the PyTorch `SelfAttention` module (q = k = v = x).

    x      : [bs, seq_len, dim_k] float32
    params : PyTorch-style weights, w* of shape (out_features, in_features)
    mask   : optional [seq_len, seq_len], multiplicative, applied AFTER softmax
    """
    B, S, Dk = x.shape
    Dv = params["wv"].shape[0]
    assert Dk == params["wq"].shape[1] == params["wk"].shape[1]
    # forward() feeds x to the value projector too, so dim_v must equal dim_k.
    assert Dk == params["wv"].shape[1] == Dv
    assert Dk % n_heads == 0 and Dv % n_heads == 0
    H = n_heads
    hd_k = Dk // H
    hd_v = Dv // H

    if mxu_dtype is None:
        mxu_dtype = _default_mxu_dtype()
    f32 = jnp.float32

    # ---- query-tile size: bounds the (H, tq, S) f32 score tile per step ----
    if q_tile is None:
        if S % 8 != 0:
            q_tile = S                        # non-sublane-aligned S: full block
        else:
            q_tile = 8
            budget = 8 << 20                  # ~8 MiB of f32 scores per step
            for cand in (1024, 512, 256, 128, 64, 32, 16, 8):
                if S % cand == 0 and H * cand * S * 4 <= budget:
                    q_tile = cand
                    break
    assert S % q_tile == 0 and (q_tile == S or q_tile % 8 == 0)
    nq = S // q_tile

    # Lane-dense output: pad the final projection's output dim to >=128 lanes so
    # kernel output stores are unmasked vst's; padding is sliced off outside.
    Dv_pad = max(128, -(-Dv // 128) * 128)

    # ---- weight prep: fold 1/sqrt(hd) into Q, fuse Q|K|V, split/pad Wf ----
    scale = 1.0 / math.sqrt(hd_k)
    w_qkv = jnp.concatenate(
        [params["wq"].T * scale, params["wk"].T, params["wv"].T],
        axis=1).astype(mxu_dtype)                                 # (Dk, 2*Dk+Dv)
    b_qkv = jnp.concatenate(
        [params["bq"] * scale, params["bk"], params["bv"]]
    ).reshape(1, -1).astype(f32)                                  # (1, 2*Dk+Dv)
    wf_heads = jnp.zeros((H, hd_v, Dv_pad), mxu_dtype).at[:, :, :Dv].set(
        params["wf"].T.reshape(H, hd_v, Dv).astype(mxu_dtype))    # (H, hd_v, Dv_pad)
    bf_pad = jnp.zeros((1, Dv_pad), f32).at[:, :Dv].set(params["bf"].astype(f32))

    has_mask = mask is not None
    if has_mask:
        mask = jnp.asarray(mask).astype(mxu_dtype)                # (S, S)

    kernel = functools.partial(
        _self_attention_kernel, n_heads=H, seq_len=S, q_tile=q_tile,
        dim_k=Dk, dim_v=Dv, has_mask=has_mask, mxu_dtype=mxu_dtype)

    inputs = [x, w_qkv, b_qkv, wf_heads, bf_pad]
    if has_mask:
        inputs.append(mask)

    # ---- VMEM budget (padded tiles, double buffers where applicable) ----
    n3 = 2 * Dk + Dv
    est = (
        2 * _padded_vmem_bytes((1, S, Dk), f32)                   # x (double buffered)
        + _padded_vmem_bytes((Dk, n3), mxu_dtype)                 # fused weights (x1)
        + _padded_vmem_bytes((1, n3), f32)
        + _padded_vmem_bytes((H, hd_v, Dv_pad), mxu_dtype)
        + _padded_vmem_bytes((1, Dv_pad), f32)
        + 2 * _padded_vmem_bytes((1, q_tile, Dv_pad), x.dtype)    # out (double buffered)
        + 2 * _padded_vmem_bytes((H, S, hd_k), mxu_dtype)         # q_sc, k_sc
        + _padded_vmem_bytes((H, S, hd_v), mxu_dtype)             # v_sc
        + 4 * H * q_tile * S * 4                                  # score/softmax temps
        + 2 * _padded_vmem_bytes((S, n3), f32)                    # projection temps
    )
    if has_mask:
        est += 2 * _padded_vmem_bytes((q_tile, S), mxu_dtype)
    # Clamp to v7x's 64 MiB physical VMEM (v5e/v6e have 128 MiB physical; raise
    # the cap there for much larger configs if needed).
    vmem_limit = int(min(max(2 * est, 8 << 20), 64 << 20))

    def _build(single_buffer_weights):
        def invariant(arr):
            # Grid-invariant operand: full-array block.  Double-buffering a
            # block whose index never changes is pure VMEM waste.
            kwargs = {}
            if single_buffer_weights:
                kwargs["pipeline_mode"] = pl.Buffered(1)
            return pl.BlockSpec(arr.shape,
                                lambda b, q, _n=arr.ndim: (0,) * _n, **kwargs)

        in_specs = [
            pl.BlockSpec((1, S, Dk), lambda b, q: (b, 0, 0)),     # resident over q
            invariant(w_qkv), invariant(b_qkv),
            invariant(wf_heads), invariant(bf_pad),
        ]
        if has_mask:
            in_specs.append(pl.BlockSpec((q_tile, S), lambda b, q: (q, 0)))

        return pl.pallas_call(
            kernel,
            out_shape=jax.ShapeDtypeStruct((B, S, Dv_pad), x.dtype),
            grid_spec=pltpu.PrefetchScalarGridSpec(
                num_scalar_prefetch=0,
                grid=(B, nq),
                in_specs=in_specs,
                out_specs=pl.BlockSpec((1, q_tile, Dv_pad),
                                       lambda b, q: (b, q, 0)),
                scratch_shapes=[
                    pltpu.VMEM((H, S, hd_k), mxu_dtype),          # q_sc
                    pltpu.VMEM((H, S, hd_k), mxu_dtype),          # k_sc
                    pltpu.VMEM((H, S, hd_v), mxu_dtype),          # v_sc
                ],
            ),
            compiler_params=pltpu.CompilerParams(
                dimension_semantics=("parallel", "arbitrary"),
                vmem_limit_bytes=vmem_limit,
            ),
        )

    try:
        out_pad = _build(True)(*inputs)
    except Exception:
        # Fallback for jax builds where single-buffering via pl.Buffered(1) is
        # not supported by the TPU pipeline lowering.
        out_pad = _build(False)(*inputs)

    return out_pad[..., :Dv]


def _reference_forward(x, params, n_heads, mask=None):
    """Pure-JAX reference mirroring the PyTorch module exactly."""
    B, S, Dk = x.shape
    Dv = params["wf"].shape[0]
    lin = lambda a, w, b: a @ w.T + b
    q = lin(x, params["wq"], params["bq"]).reshape(B, S, n_heads, -1).transpose(0, 2, 1, 3)
    k = lin(x, params["wk"], params["bk"]).reshape(B, S, n_heads, -1).transpose(0, 2, 1, 3)
    v = lin(x, params["wv"], params["bv"]).reshape(B, S, n_heads, -1).transpose(0, 2, 1, 3)
    hd = k.shape[-1]
    sim = jnp.einsum("bhqd,bhkd->bhqk", q, k) / math.sqrt(hd)
    sim = jax.nn.softmax(sim, axis=-1)
    if mask is not None:
        sim = sim * mask
    o = jnp.einsum("bhqk,bhkd->bhqd", sim, v).transpose(0, 2, 1, 3).reshape(B, S, Dv)
    return lin(o, params["wf"], params["bf"])


if __name__ == "__main__":
    # Module config (forward uses q = k = v = x, so dim_k must equal dim_v).
    dim_k = 32
    dim_v = 32
    n_heads = 4
    bs, seq_len = 2, 16

    key = jax.random.PRNGKey(0)
    keys = jax.random.split(key, 10)

    def init_linear(kw, kb, out_dim, in_dim):
        bound = 1.0 / math.sqrt(in_dim)
        w = jax.random.uniform(kw, (out_dim, in_dim), jnp.float32, -bound, bound)
        b = jax.random.uniform(kb, (out_dim,), jnp.float32, -bound, bound)
        return w, b

    wq, bq = init_linear(keys[0], keys[1], dim_k, dim_k)
    wk, bk = init_linear(keys[2], keys[3], dim_k, dim_k)
    wv, bv = init_linear(keys[4], keys[5], dim_v, dim_v)
    wf, bf = init_linear(keys[6], keys[7], dim_v, dim_v)
    params = dict(wq=wq, bq=bq, wk=wk, bk=bk, wv=wv, bv=bv, wf=wf, bf=bf)

    x = jax.random.normal(keys[8], (bs, seq_len, dim_k), jnp.float32)

    # 1) unmasked, f32 MXU operands, default query tile  -> grid (2, 1)
    out = self_attention_forward(x, params, n_heads, mask=None,
                                 mxu_dtype=jnp.float32)
    out = jax.block_until_ready(out)
    ref = _reference_forward(x, params, n_heads, mask=None)
    assert out.shape == (bs, seq_len, dim_v)
    assert jnp.allclose(out, ref, atol=5e-3, rtol=5e-3), "mismatch vs reference (f32)"

    # 2) masked, auto MXU dtype (bf16 on v6e/v7x), q_tile=8 -> grid (2, 2)
    mask = (jax.random.uniform(keys[9], (seq_len, seq_len)) > 0.3).astype(jnp.float32)
    out_m = self_attention_forward(x, params, n_heads, mask=mask, q_tile=8)
    out_m = jax.block_until_ready(out_m)
    ref_m = _reference_forward(x, params, n_heads, mask=mask)
    assert jnp.allclose(out_m, ref_m, atol=5e-2, rtol=5e-2), "mismatch vs reference (masked)"

    print("KERNEL_OK")
</pallas_src>

<mosaic_0001>
module attributes {stable_mosaic.version = 11 : i64} {
  func.func @_self_attention_kernel(%arg0: i32, %arg1: i32, %arg2: memref<1x16x32xf32, #tpu.memory_space<vmem>>, %arg3: memref<32x96xf32, #tpu.memory_space<vmem>>, %arg4: memref<1x96xf32, #tpu.memory_space<vmem>>, %arg5: memref<4x8x128xf32, #tpu.memory_space<vmem>>, %arg6: memref<1x128xf32, #tpu.memory_space<vmem>>, %arg7: memref<1x16x128xf32, #tpu.memory_space<vmem>>, %arg8: memref<4x16x8xf32, #tpu.memory_space<vmem>>, %arg9: memref<4x16x8xf32, #tpu.memory_space<vmem>>, %arg10: memref<4x16x8xf32, #tpu.memory_space<vmem>>) attributes {dimension_semantics = [#tpu.dimension_semantics<parallel>, #tpu.dimension_semantics<arbitrary>], iteration_bounds = array<i64: 2, 1>, scalar_prefetch = 0 : i64, scratch_operands = 3 : i64, tpu.core_type = #tpu.core_type<tc>, window_params = [{transform_indices = @transform_0, window_bounds = array<i64: 1, 16, 32>}, {pipeline_mode = #tpu.pipeline_mode<synchronous>, transform_indices = @transform_1, window_bounds = array<i64: 32, 96>}, {pipeline_mode = #tpu.pipeline_mode<synchronous>, transform_indices = @transform_2, window_bounds = array<i64: 1, 96>}, {pipeline_mode = #tpu.pipeline_mode<synchronous>, transform_indices = @transform_3, window_bounds = array<i64: 4, 8, 128>}, {pipeline_mode = #tpu.pipeline_mode<synchronous>, transform_indices = @transform_4, window_bounds = array<i64: 1, 128>}, {transform_indices = @transform_5, window_bounds = array<i64: 1, 16, 128>}]} {
    %c0_i32 = arith.constant 0 : i32
    %0 = arith.cmpi eq, %arg1, %c0_i32 : i32
    %1 = arith.extui %0 : i1 to i32
    %c0_i32_0 = arith.constant 0 : i32
    %2 = arith.cmpi ne, %1, %c0_i32_0 : i32
    scf.if %2 {
      %c0_30 = arith.constant 0 : index
      %c0_31 = arith.constant 0 : index
      %c0_32 = arith.constant 0 : index
      %52 = vector.load %arg2[%c0_30, %c0_31, %c0_32] : memref<1x16x32xf32, #tpu.memory_space<vmem>>, vector<1x16x32xf32>
      %53 = vector.shape_cast %52 : vector<1x16x32xf32> to vector<16x32xf32>
      %c0_33 = arith.constant 0 : index
      %c0_34 = arith.constant 0 : index
      %54 = vector.load %arg3[%c0_33, %c0_34] : memref<32x96xf32, #tpu.memory_space<vmem>>, vector<32x96xf32>
      %cst_35 = arith.constant dense<0.000000e+00> : vector<16x96xf32>
      %55 = tpu.matmul %53, %54, %cst_35 {dimension_numbers = #tpu.dot_dimension_numbers<[1], [0], [0], [1], [0, 0, 1, 1], [], []>} : vector<16x32xf32>, vector<32x96xf32>, vector<16x96xf32> -> vector<16x96xf32>
      %c0_36 = arith.constant 0 : index
      %c0_37 = arith.constant 0 : index
      %56 = vector.load %arg4[%c0_36, %c0_37] : memref<1x96xf32, #tpu.memory_space<vmem>>, vector<1x96xf32>
      %57 = vector.broadcast %56 : vector<1x96xf32> to vector<16x96xf32>
      %58 = arith.addf %55, %57 : vector<16x96xf32>
      %59 = vector.extract_strided_slice %58 {offsets = [0, 0], sizes = [16, 8], strides = [1, 1]} : vector<16x96xf32> to vector<16x8xf32>
      %c0_38 = arith.constant 0 : index
      %c0_39 = arith.constant 0 : index
      %c0_40 = arith.constant 0 : index
      %60 = vector.load %arg8[%c0_38, %c0_39, %c0_40] : memref<4x16x8xf32, #tpu.memory_space<vmem>>, vector<1x16x8xf32>
      %61 = vector.shape_cast %60 : vector<1x16x8xf32> to vector<16x8xf32>
      %62 = vector.shape_cast %59 : vector<16x8xf32> to vector<1x16x8xf32>
      tpu.vector_store %arg8[%c0_38, %c0_39, %c0_40], %62 {strides = array<i32>} : memref<4x16x8xf32, #tpu.memory_space<vmem>>, vector<1x16x8xf32>,
      %63 = vector.extract_strided_slice %58 {offsets = [0, 32], sizes = [16, 8], strides = [1, 1]} : vector<16x96xf32> to vector<16x8xf32>
      %c0_41 = arith.constant 0 : index
      %c0_42 = arith.constant 0 : index
      %c0_43 = arith.constant 0 : index
      %64 = vector.load %arg9[%c0_41, %c0_42, %c0_43] : memref<4x16x8xf32, #tpu.memory_space<vmem>>, vector<1x16x8xf32>
      %65 = vector.shape_cast %64 : vector<1x16x8xf32> to vector<16x8xf32>
      %66 = vector.shape_cast %63 : vector<16x8xf32> to vector<1x16x8xf32>
      tpu.vector_store %arg9[%c0_41, %c0_42, %c0_43], %66 {strides = array<i32>} : memref<4x16x8xf32, #tpu.memory_space<vmem>>, vector<1x16x8xf32>,
      %67 = vector.extract_strided_slice %58 {offsets = [0, 64], sizes = [16, 8], strides = [1, 1]} : vector<16x96xf32> to vector<16x8xf32>
      %c0_44 = arith.constant 0 : index
      %c0_45 = arith.constant 0 : index
      %c0_46 = arith.constant 0 : index
      %68 = vector.load %arg10[%c0_44, %c0_45, %c0_46] : memref<4x16x8xf32, #tpu.memory_space<vmem>>, vector<1x16x8xf32>
      %69 = vector.shape_cast %68 : vector<1x16x8xf32> to vector<16x8xf32>
      %70 = vector.shape_cast %67 : vector<16x8xf32> to vector<1x16x8xf32>
      tpu.vector_store %arg10[%c0_44, %c0_45, %c0_46], %70 {strides = array<i32>} : memref<4x16x8xf32, #tpu.memory_space<vmem>>, vector<1x16x8xf32>,
      %71 = vector.extract_strided_slice %58 {offsets = [0, 8], sizes = [16, 8], strides = [1, 1]} : vector<16x96xf32> to vector<16x8xf32>
      %c1_47 = arith.constant 1 : index
      %c0_48 = arith.constant 0 : index
      %c0_49 = arith.constant 0 : index
      %72 = vector.load %arg8[%c1_47, %c0_48, %c0_49] : memref<4x16x8xf32, #tpu.memory_space<vmem>>, vector<1x16x8xf32>
      %73 = vector.shape_cast %72 : vector<1x16x8xf32> to vector<16x8xf32>
      %74 = vector.shape_cast %71 : vector<16x8xf32> to vector<1x16x8xf32>
      tpu.vector_store %arg8[%c1_47, %c0_48, %c0_49], %74 {strides = array<i32>} : memref<4x16x8xf32, #tpu.memory_space<vmem>>, vector<1x16x8xf32>,
      %75 = vector.extract_strided_slice %58 {offsets = [0, 40], sizes = [16, 8], strides = [1, 1]} : vector<16x96xf32> to vector<16x8xf32>
      %c1_50 = arith.constant 1 : index
      %c0_51 = arith.constant 0 : index
      %c0_52 = arith.constant 0 : index
      %76 = vector.load %arg9[%c1_50, %c0_51, %c0_52] : memref<4x16x8xf32, #tpu.memory_space<vmem>>, vector<1x16x8xf32>
      %77 = vector.shape_cast %76 : vector<1x16x8xf32> to vector<16x8xf32>
      %78 = vector.shape_cast %75 : vector<16x8xf32> to vector<1x16x8xf32>
      tpu.vector_store %arg9[%c1_50, %c0_51, %c0_52], %78 {strides = array<i32>} : memref<4x16x8xf32, #tpu.memory_space<vmem>>, vector<1x16x8xf32>,
      %79 = vector.extract_strided_slice %58 {offsets = [0, 72], sizes = [16, 8], strides = [1, 1]} : vector<16x96xf32> to vector<16x8xf32>
      %c1_53 = arith.constant 1 : index
      %c0_54 = arith.constant 0 : index
      %c0_55 = arith.constant 0 : index
      %80 = vector.load %arg10[%c1_53, %c0_54, %c0_55] : memref<4x16x8xf32, #tpu.memory_space<vmem>>, vector<1x16x8xf32>
      %81 = vector.shape_cast %80 : vector<1x16x8xf32> to vector<16x8xf32>
      %82 = vector.shape_cast %79 : vector<16x8xf32> to vector<1x16x8xf32>
      tpu.vector_store %arg10[%c1_53, %c0_54, %c0_55], %82 {strides = array<i32>} : memref<4x16x8xf32, #tpu.memory_space<vmem>>, vector<1x16x8xf32>,
      %83 = vector.extract_strided_slice %58 {offsets = [0, 16], sizes = [16, 8], strides = [1, 1]} : vector<16x96xf32> to vector<16x8xf32>
      %c2_56 = arith.constant 2 : index
      %c0_57 = arith.constant 0 : index
      %c0_58 = arith.constant 0 : index
      %84 = vector.load %arg8[%c2_56, %c0_57, %c0_58] : memref<4x16x8xf32, #tpu.memory_space<vmem>>, vector<1x16x8xf32>
      %85 = vector.shape_cast %84 : vector<1x16x8xf32> to vector<16x8xf32>
      %86 = vector.shape_cast %83 : vector<16x8xf32> to vector<1x16x8xf32>
      tpu.vector_store %arg8[%c2_56, %c0_57, %c0_58], %86 {strides = array<i32>} : memref<4x16x8xf32, #tpu.memory_space<vmem>>, vector<1x16x8xf32>,
      %87 = vector.extract_strided_slice %58 {offsets = [0, 48], sizes = [16, 8], strides = [1, 1]} : vector<16x96xf32> to vector<16x8xf32>
      %c2_59 = arith.constant 2 : index
      %c0_60 = arith.constant 0 : index
      %c0_61 = arith.constant 0 : index
      %88 = vector.load %arg9[%c2_59, %c0_60, %c0_61] : memref<4x16x8xf32, #tpu.memory_space<vmem>>, vector<1x16x8xf32>
      %89 = vector.shape_cast %88 : vector<1x16x8xf32> to vector<16x8xf32>
      %90 = vector.shape_cast %87 : vector<16x8xf32> to vector<1x16x8xf32>
      tpu.vector_store %arg9[%c2_59, %c0_60, %c0_61], %90 {strides = array<i32>} : memref<4x16x8xf32, #tpu.memory_space<vmem>>, vector<1x16x8xf32>,
      %91 = vector.extract_strided_slice %58 {offsets = [0, 80], sizes = [16, 8], strides = [1, 1]} : vector<16x96xf32> to vector<16x8xf32>
      %c2_62 = arith.constant 2 : index
      %c0_63 = arith.constant 0 : index
      %c0_64 = arith.constant 0 : index
      %92 = vector.load %arg10[%c2_62, %c0_63, %c0_64] : memref<4x16x8xf32, #tpu.memory_space<vmem>>, vector<1x16x8xf32>
      %93 = vector.shape_cast %92 : vector<1x16x8xf32> to vector<16x8xf32>
      %94 = vector.shape_cast %91 : vector<16x8xf32> to vector<1x16x8xf32>
      tpu.vector_store %arg10[%c2_62, %c0_63, %c0_64], %94 {strides = array<i32>} : memref<4x16x8xf32, #tpu.memory_space<vmem>>, vector<1x16x8xf32>,
      %95 = vector.extract_strided_slice %58 {offsets = [0, 24], sizes = [16, 8], strides = [1, 1]} : vector<16x96xf32> to vector<16x8xf32>
      %c3_65 = arith.constant 3 : index
      %c0_66 = arith.constant 0 : index
      %c0_67 = arith.constant 0 : index
      %96 = vector.load %arg8[%c3_65, %c0_66, %c0_67] : memref<4x16x8xf32, #tpu.memory_space<vmem>>, vector<1x16x8xf32>
      %97 = vector.shape_cast %96 : vector<1x16x8xf32> to vector<16x8xf32>
      %98 = vector.shape_cast %95 : vector<16x8xf32> to vector<1x16x8xf32>
      tpu.vector_store %arg8[%c3_65, %c0_66, %c0_67], %98 {strides = array<i32>} : memref<4x16x8xf32, #tpu.memory_space<vmem>>, vector<1x16x8xf32>,
      %99 = vector.extract_strided_slice %58 {offsets = [0, 56], sizes = [16, 8], strides = [1, 1]} : vector<16x96xf32> to vector<16x8xf32>
      %c3_68 = arith.constant 3 : index
      %c0_69 = arith.constant 0 : index
      %c0_70 = arith.constant 0 : index
      %100 = vector.load %arg9[%c3_68, %c0_69, %c0_70] : memref<4x16x8xf32, #tpu.memory_space<vmem>>, vector<1x16x8xf32>
      %101 = vector.shape_cast %100 : vector<1x16x8xf32> to vector<16x8xf32>
      %102 = vector.shape_cast %99 : vector<16x8xf32> to vector<1x16x8xf32>
      tpu.vector_store %arg9[%c3_68, %c0_69, %c0_70], %102 {strides = array<i32>} : memref<4x16x8xf32, #tpu.memory_space<vmem>>, vector<1x16x8xf32>,
      %103 = vector.extract_strided_slice %58 {offsets = [0, 88], sizes = [16, 8], strides = [1, 1]} : vector<16x96xf32> to vector<16x8xf32>
      %c3_71 = arith.constant 3 : index
      %c0_72 = arith.constant 0 : index
      %c0_73 = arith.constant 0 : index
      %104 = vector.load %arg10[%c3_71, %c0_72, %c0_73] : memref<4x16x8xf32, #tpu.memory_space<vmem>>, vector<1x16x8xf32>
      %105 = vector.shape_cast %104 : vector<1x16x8xf32> to vector<16x8xf32>
      %106 = vector.shape_cast %103 : vector<16x8xf32> to vector<1x16x8xf32>
      tpu.vector_store %arg10[%c3_71, %c0_72, %c0_73], %106 {strides = array<i32>} : memref<4x16x8xf32, #tpu.memory_space<vmem>>, vector<1x16x8xf32>,
    } else {
    }
    %c16_i32 = arith.constant 16 : i32
    %3 = arith.muli %arg1, %c16_i32 : i32
    %4 = tpu.assume_multiple %3, 16 : i32
    %c0 = arith.constant 0 : index
    %5 = arith.index_cast %4 : i32 to index
    %c0_1 = arith.constant 0 : index
    %6 = vector.load %arg8[%c0, %5, %c0_1] : memref<4x16x8xf32, #tpu.memory_space<vmem>>, vector<4x16x8xf32>
    %c0_2 = arith.constant 0 : index
    %c0_3 = arith.constant 0 : index
    %c0_4 = arith.constant 0 : index
    %7 = vector.load %arg9[%c0_2, %c0_3, %c0_4] : memref<4x16x8xf32, #tpu.memory_space<vmem>>, vector<4x16x8xf32>
    %c0_5 = arith.constant 0 : index
    %c0_6 = arith.constant 0 : index
    %c0_7 = arith.constant 0 : index
    %8 = vector.load %arg10[%c0_5, %c0_6, %c0_7] : memref<4x16x8xf32, #tpu.memory_space<vmem>>, vector<4x16x8xf32>
    "tpu.trace_start"() <{level = 10 : i32, message = "hqd,hkd->hqk"}> : () -> ()
    %cst = arith.constant dense<0.000000e+00> : vector<4x16x16xf32>
    %9 = tpu.matmul %6, %7, %cst {dimension_numbers = #tpu.dot_dimension_numbers<[2], [2], [1], [1], [0, 0, 0, 1, 1, 1], [0], [0]>} : vector<4x16x8xf32>, vector<4x16x8xf32>, vector<4x16x16xf32> -> vector<4x16x16xf32>
    "tpu.trace_stop"() : () -> ()
    %cst_8 = arith.constant dense<0xFF800000> : vector<4x16xf32>
    %10 = vector.multi_reduction <maximumf>, %9, %cst_8 [2] : vector<4x16x16xf32> to vector<4x16xf32>
    %11 = vector.shape_cast %10 : vector<4x16xf32> to vector<4x16x1xf32>
    %12 = vector.broadcast %11 : vector<4x16x1xf32> to vector<4x16x16xf32>
    %13 = arith.subf %9, %12 : vector<4x16x16xf32>
    %14 = math.exp %13 : vector<4x16x16xf32>
    %cst_9 = arith.constant dense<0.000000e+00> : vector<4x16xf32>
    %15 = vector.multi_reduction <add>, %14, %cst_9 [2] : vector<4x16x16xf32> to vector<4x16xf32>
    %16 = vector.shape_cast %15 : vector<4x16xf32> to vector<4x16x1xf32>
    %17 = tpu.reciprocal %16 {approx = true} : vector<4x16x1xf32> -> vector<4x16x1xf32>
    %18 = vector.broadcast %17 : vector<4x16x1xf32> to vector<4x16x16xf32>
    %19 = arith.mulf %14, %18 : vector<4x16x16xf32>
    "tpu.trace_start"() <{level = 10 : i32, message = "hqk,hkd->hqd"}> : () -> ()
    %cst_10 = arith.constant dense<0.000000e+00> : vector<4x16x8xf32>
    %20 = tpu.matmul %19, %8, %cst_10 {dimension_numbers = #tpu.dot_dimension_numbers<[2], [1], [1], [2], [0, 0, 0, 1, 1, 2], [0], [0]>} : vector<4x16x16xf32>, vector<4x16x8xf32>, vector<4x16x8xf32> -> vector<4x16x8xf32>
    %cst_11 = arith.constant 0.000000e+00 : f32
    "tpu.trace_stop"() : () -> ()
    %21 = vector.broadcast %cst_11 : f32 to vector<16x128xf32>
    %22 = vector.extract_strided_slice %20 {offsets = [0, 0, 0], sizes = [1, 16, 8], strides = [1, 1, 1]} : vector<4x16x8xf32> to vector<1x16x8xf32>
    %23 = vector.shape_cast %22 : vector<1x16x8xf32> to vector<16x8xf32>
    %c0_12 = arith.constant 0 : index
    %c0_13 = arith.constant 0 : index
    %c0_14 = arith.constant 0 : index
    %24 = vector.load %arg5[%c0_12, %c0_13, %c0_14] : memref<4x8x128xf32, #tpu.memory_space<vmem>>, vector<1x8x128xf32>
    %25 = vector.shape_cast %24 : vector<1x8x128xf32> to vector<8x128xf32>
    %cst_15 = arith.constant dense<0.000000e+00> : vector<16x128xf32>
    %26 = tpu.matmul %23, %25, %cst_15 {dimension_numbers = #tpu.dot_dimension_numbers<[1], [0], [0], [1], [0, 0, 1, 1], [], []>} : vector<16x8xf32>, vector<8x128xf32>, vector<16x128xf32> -> vector<16x128xf32>
    %27 = arith.addf %21, %26 : vector<16x128xf32>
    %28 = vector.extract_strided_slice %20 {offsets = [1, 0, 0], sizes = [1, 16, 8], strides = [1, 1, 1]} : vector<4x16x8xf32> to vector<1x16x8xf32>
    %29 = vector.shape_cast %28 : vector<1x16x8xf32> to vector<16x8xf32>
    %c1 = arith.constant 1 : index
    %c0_16 = arith.constant 0 : index
    %c0_17 = arith.constant 0 : index
    %30 = vector.load %arg5[%c1, %c0_16, %c0_17] : memref<4x8x128xf32, #tpu.memory_space<vmem>>, vector<1x8x128xf32>
    %31 = vector.shape_cast %30 : vector<1x8x128xf32> to vector<8x128xf32>
    %cst_18 = arith.constant dense<0.000000e+00> : vector<16x128xf32>
    %32 = tpu.matmul %29, %31, %cst_18 {dimension_numbers = #tpu.dot_dimension_numbers<[1], [0], [0], [1], [0, 0, 1, 1], [], []>} : vector<16x8xf32>, vector<8x128xf32>, vector<16x128xf32> -> vector<16x128xf32>
    %33 = arith.addf %27, %32 : vector<16x128xf32>
    %34 = vector.extract_strided_slice %20 {offsets = [2, 0, 0], sizes = [1, 16, 8], strides = [1, 1, 1]} : vector<4x16x8xf32> to vector<1x16x8xf32>
    %35 = vector.shape_cast %34 : vector<1x16x8xf32> to vector<16x8xf32>
    %c2 = arith.constant 2 : index
    %c0_19 = arith.constant 0 : index
    %c0_20 = arith.constant 0 : index
    %36 = vector.load %arg5[%c2, %c0_19, %c0_20] : memref<4x8x128xf32, #tpu.memory_space<vmem>>, vector<1x8x128xf32>
    %37 = vector.shape_cast %36 : vector<1x8x128xf32> to vector<8x128xf32>
    %cst_21 = arith.constant dense<0.000000e+00> : vector<16x128xf32>
    %38 = tpu.matmul %35, %37, %cst_21 {dimension_numbers = #tpu.dot_dimension_numbers<[1], [0], [0], [1], [0, 0, 1, 1], [], []>} : vector<16x8xf32>, vector<8x128xf32>, vector<16x128xf32> -> vector<16x128xf32>
    %39 = arith.addf %33, %38 : vector<16x128xf32>
    %40 = vector.extract_strided_slice %20 {offsets = [3, 0, 0], sizes = [1, 16, 8], strides = [1, 1, 1]} : vector<4x16x8xf32> to vector<1x16x8xf32>
    %41 = vector.shape_cast %40 : vector<1x16x8xf32> to vector<16x8xf32>
    %c3 = arith.constant 3 : index
    %c0_22 = arith.constant 0 : index
    %c0_23 = arith.constant 0 : index
    %42 = vector.load %arg5[%c3, %c0_22, %c0_23] : memref<4x8x128xf32, #tpu.memory_space<vmem>>, vector<1x8x128xf32>
    %43 = vector.shape_cast %42 : vector<1x8x128xf32> to vector<8x128xf32>
    %cst_24 = arith.constant dense<0.000000e+00> : vector<16x128xf32>
    %44 = tpu.matmul %41, %43, %cst_24 {dimension_numbers = #tpu.dot_dimension_numbers<[1], [0], [0], [1], [0, 0, 1, 1], [], []>} : vector<16x8xf32>, vector<8x128xf32>, vector<16x128xf32> -> vector<16x128xf32>
    %45 = arith.addf %39, %44 : vector<16x128xf32>
    %c0_25 = arith.constant 0 : index
    %c0_26 = arith.constant 0 : index
    %46 = vector.load %arg6[%c0_25, %c0_26] : memref<1x128xf32, #tpu.memory_space<vmem>>, vector<1x128xf32>
    %47 = vector.broadcast %46 : vector<1x128xf32> to vector<16x128xf32>
    %48 = arith.addf %45, %47 : vector<16x128xf32>
    %c0_27 = arith.constant 0 : index
    %c0_28 = arith.constant 0 : index
    %c0_29 = arith.constant 0 : index
    %49 = vector.load %arg7[%c0_27, %c0_28, %c0_29] : memref<1x16x128xf32, #tpu.memory_space<vmem>>, vector<1x16x128xf32>
    %50 = vector.shape_cast %49 : vector<1x16x128xf32> to vector<16x128xf32>
    %51 = vector.shape_cast %48 : vector<16x128xf32> to vector<1x16x128xf32>
    tpu.vector_store %arg7[%c0_27, %c0_28, %c0_29], %51 {strides = array<i32>} : memref<1x16x128xf32, #tpu.memory_space<vmem>>, vector<1x16x128xf32>,
    return
  }
  func.func @transform_0(%arg0: i32, %arg1: i32) -> (i32, i32, i32) {
    %c0_i32 = arith.constant 0 : i32
    %c0_i32_0 = arith.constant 0 : i32
    %c0_i32_1 = arith.constant 0 : i32
    return %arg0, %c0_i32, %c0_i32_0 : i32, i32, i32
  }
  func.func @transform_1(%arg0: i32, %arg1: i32) -> (i32, i32) {
    %c0_i32 = arith.constant 0 : i32
    %c0_i32_0 = arith.constant 0 : i32
    %c0_i32_1 = arith.constant 0 : i32
    return %c0_i32, %c0_i32_0 : i32, i32
  }
  func.func @transform_2(%arg0: i32, %arg1: i32) -> (i32, i32) {
    %c0_i32 = arith.constant 0 : i32
    %c0_i32_0 = arith.constant 0 : i32
    %c0_i32_1 = arith.constant 0 : i32
    return %c0_i32, %c0_i32_0 : i32, i32
  }
  func.func @transform_3(%arg0: i32, %arg1: i32) -> (i32, i32, i32) {
    %c0_i32 = arith.constant 0 : i32
    %c0_i32_0 = arith.constant 0 : i32
    %c0_i32_1 = arith.constant 0 : i32
    %c0_i32_2 = arith.constant 0 : i32
    return %c0_i32, %c0_i32_0, %c0_i32_1 : i32, i32, i32
  }
  func.func @transform_4(%arg0: i32, %arg1: i32) -> (i32, i32) {
    %c0_i32 = arith.constant 0 : i32
    %c0_i32_0 = arith.constant 0 : i32
    %c0_i32_1 = arith.constant 0 : i32
    return %c0_i32, %c0_i32_0 : i32, i32
  }
  func.func @transform_5(%arg0: i32, %arg1: i32) -> (i32, i32, i32) {
    %c0_i32 = arith.constant 0 : i32
    %c0_i32_0 = arith.constant 0 : i32
    return %arg0, %arg1, %c0_i32 : i32, i32, i32
  }
}

module attributes {stable_mosaic.version = 11 : i64} {
  func.func @_self_attention_kernel(%arg0: i32, %arg1: i32, %arg2: memref<1x16x32xf32, #tpu.memory_space<vmem>>, %arg3: memref<32x96xf32, #tpu.memory_space<vmem>>, %arg4: memref<1x96xf32, #tpu.memory_space<vmem>>, %arg5: memref<4x8x128xf32, #tpu.memory_space<vmem>>, %arg6: memref<1x128xf32, #tpu.memory_space<vmem>>, %arg7: memref<1x16x128xf32, #tpu.memory_space<vmem>>, %arg8: memref<4x16x8xf32, #tpu.memory_space<vmem>>, %arg9: memref<4x16x8xf32, #tpu.memory_space<vmem>>, %arg10: memref<4x16x8xf32, #tpu.memory_space<vmem>>) attributes {dimension_semantics = [#tpu.dimension_semantics<parallel>, #tpu.dimension_semantics<arbitrary>], iteration_bounds = array<i64: 2, 1>, scalar_prefetch = 0 : i64, scratch_operands = 3 : i64, tpu.core_type = #tpu.core_type<tc>, window_params = [{transform_indices = @transform_0, window_bounds = array<i64: 1, 16, 32>}, {pipeline_mode = #tpu.pipeline_mode<synchronous>, transform_indices = @transform_1, window_bounds = array<i64: 32, 96>}, {pipeline_mode = #tpu.pipeline_mode<synchronous>, transform_indices = @transform_2, window_bounds = array<i64: 1, 96>}, {pipeline_mode = #tpu.pipeline_mode<synchronous>, transform_indices = @transform_3, window_bounds = array<i64: 4, 8, 128>}, {pipeline_mode = #tpu.pipeline_mode<synchronous>, transform_indices = @transform_4, window_bounds = array<i64: 1, 128>}, {transform_indices = @transform_5, window_bounds = array<i64: 1, 16, 128>}]} {
    %c0_i32 = arith.constant 0 : i32
    %0 = arith.cmpi eq, %arg1, %c0_i32 : i32
    %1 = arith.extui %0 : i1 to i32
    %c0_i32_0 = arith.constant 0 : i32
    %2 = arith.cmpi ne, %1, %c0_i32_0 : i32
    scf.if %2 {
      %c0_30 = arith.constant 0 : index
      %c0_31 = arith.constant 0 : index
      %c0_32 = arith.constant 0 : index
      %52 = vector.load %arg2[%c0_30, %c0_31, %c0_32] : memref<1x16x32xf32, #tpu.memory_space<vmem>>, vector<1x16x32xf32>
      %53 = vector.shape_cast %52 : vector<1x16x32xf32> to vector<16x32xf32>
      %c0_33 = arith.constant 0 : index
      %c0_34 = arith.constant 0 : index
      %54 = vector.load %arg3[%c0_33, %c0_34] : memref<32x96xf32, #tpu.memory_space<vmem>>, vector<32x96xf32>
      %cst_35 = arith.constant dense<0.000000e+00> : vector<16x96xf32>
      %55 = tpu.matmul %53, %54, %cst_35 {dimension_numbers = #tpu.dot_dimension_numbers<[1], [0], [0], [1], [0, 0, 1, 1], [], []>} : vector<16x32xf32>, vector<32x96xf32>, vector<16x96xf32> -> vector<16x96xf32>
      %c0_36 = arith.constant 0 : index
      %c0_37 = arith.constant 0 : index
      %56 = vector.load %arg4[%c0_36, %c0_37] : memref<1x96xf32, #tpu.memory_space<vmem>>, vector<1x96xf32>
      %57 = vector.broadcast %56 : vector<1x96xf32> to vector<16x96xf32>
      %58 = arith.addf %55, %57 : vector<16x96xf32>
      %59 = vector.extract_strided_slice %58 {offsets = [0, 0], sizes = [16, 8], strides = [1, 1]} : vector<16x96xf32> to vector<16x8xf32>
      %c0_38 = arith.constant 0 : index
      %c0_39 = arith.constant 0 : index
      %c0_40 = arith.constant 0 : index
      %60 = vector.load %arg8[%c0_38, %c0_39, %c0_40] : memref<4x16x8xf32, #tpu.memory_space<vmem>>, vector<1x16x8xf32>
      %61 = vector.shape_cast %60 : vector<1x16x8xf32> to vector<16x8xf32>
      %62 = vector.shape_cast %59 : vector<16x8xf32> to vector<1x16x8xf32>
      tpu.vector_store %arg8[%c0_38, %c0_39, %c0_40], %62 {strides = array<i32>} : memref<4x16x8xf32, #tpu.memory_space<vmem>>, vector<1x16x8xf32>,
      %63 = vector.extract_strided_slice %58 {offsets = [0, 32], sizes = [16, 8], strides = [1, 1]} : vector<16x96xf32> to vector<16x8xf32>
      %c0_41 = arith.constant 0 : index
      %c0_42 = arith.constant 0 : index
      %c0_43 = arith.constant 0 : index
      %64 = vector.load %arg9[%c0_41, %c0_42, %c0_43] : memref<4x16x8xf32, #tpu.memory_space<vmem>>, vector<1x16x8xf32>
      %65 = vector.shape_cast %64 : vector<1x16x8xf32> to vector<16x8xf32>
      %66 = vector.shape_cast %63 : vector<16x8xf32> to vector<1x16x8xf32>
      tpu.vector_store %arg9[%c0_41, %c0_42, %c0_43], %66 {strides = array<i32>} : memref<4x16x8xf32, #tpu.memory_space<vmem>>, vector<1x16x8xf32>,
      %67 = vector.extract_strided_slice %58 {offsets = [0, 64], sizes = [16, 8], strides = [1, 1]} : vector<16x96xf32> to vector<16x8xf32>
      %c0_44 = arith.constant 0 : index
      %c0_45 = arith.constant 0 : index
      %c0_46 = arith.constant 0 : index
      %68 = vector.load %arg10[%c0_44, %c0_45, %c0_46] : memref<4x16x8xf32, #tpu.memory_space<vmem>>, vector<1x16x8xf32>
      %69 = vector.shape_cast %68 : vector<1x16x8xf32> to vector<16x8xf32>
      %70 = vector.shape_cast %67 : vector<16x8xf32> to vector<1x16x8xf32>
      tpu.vector_store %arg10[%c0_44, %c0_45, %c0_46], %70 {strides = array<i32>} : memref<4x16x8xf32, #tpu.memory_space<vmem>>, vector<1x16x8xf32>,
      %71 = vector.extract_strided_slice %58 {offsets = [0, 8], sizes = [16, 8], strides = [1, 1]} : vector<16x96xf32> to vector<16x8xf32>
      %c1_47 = arith.constant 1 : index
      %c0_48 = arith.constant 0 : index
      %c0_49 = arith.constant 0 : index
      %72 = vector.load %arg8[%c1_47, %c0_48, %c0_49] : memref<4x16x8xf32, #tpu.memory_space<vmem>>, vector<1x16x8xf32>
      %73 = vector.shape_cast %72 : vector<1x16x8xf32> to vector<16x8xf32>
      %74 = vector.shape_cast %71 : vector<16x8xf32> to vector<1x16x8xf32>
      tpu.vector_store %arg8[%c1_47, %c0_48, %c0_49], %74 {strides = array<i32>} : memref<4x16x8xf32, #tpu.memory_space<vmem>>, vector<1x16x8xf32>,
      %75 = vector.extract_strided_slice %58 {offsets = [0, 40], sizes = [16, 8], strides = [1, 1]} : vector<16x96xf32> to vector<16x8xf32>
      %c1_50 = arith.constant 1 : index
      %c0_51 = arith.constant 0 : index
      %c0_52 = arith.constant 0 : index
      %76 = vector.load %arg9[%c1_50, %c0_51, %c0_52] : memref<4x16x8xf32, #tpu.memory_space<vmem>>, vector<1x16x8xf32>
      %77 = vector.shape_cast %76 : vector<1x16x8xf32> to vector<16x8xf32>
      %78 = vector.shape_cast %75 : vector<16x8xf32> to vector<1x16x8xf32>
      tpu.vector_store %arg9[%c1_50, %c0_51, %c0_52], %78 {strides = array<i32>} : memref<4x16x8xf32, #tpu.memory_space<vmem>>, vector<1x16x8xf32>,
      %79 = vector.extract_strided_slice %58 {offsets = [0, 72], sizes = [16, 8], strides = [1, 1]} : vector<16x96xf32> to vector<16x8xf32>
      %c1_53 = arith.constant 1 : index
      %c0_54 = arith.constant 0 : index
      %c0_55 = arith.constant 0 : index
      %80 = vector.load %arg10[%c1_53, %c0_54, %c0_55] : memref<4x16x8xf32, #tpu.memory_space<vmem>>, vector<1x16x8xf32>
      %81 = vector.shape_cast %80 : vector<1x16x8xf32> to vector<16x8xf32>
      %82 = vector.shape_cast %79 : vector<16x8xf32> to vector<1x16x8xf32>
      tpu.vector_store %arg10[%c1_53, %c0_54, %c0_55], %82 {strides = array<i32>} : memref<4x16x8xf32, #tpu.memory_space<vmem>>, vector<1x16x8xf32>,
      %83 = vector.extract_strided_slice %58 {offsets = [0, 16], sizes = [16, 8], strides = [1, 1]} : vector<16x96xf32> to vector<16x8xf32>
      %c2_56 = arith.constant 2 : index
      %c0_57 = arith.constant 0 : index
      %c0_58 = arith.constant 0 : index
      %84 = vector.load %arg8[%c2_56, %c0_57, %c0_58] : memref<4x16x8xf32, #tpu.memory_space<vmem>>, vector<1x16x8xf32>
      %85 = vector.shape_cast %84 : vector<1x16x8xf32> to vector<16x8xf32>
      %86 = vector.shape_cast %83 : vector<16x8xf32> to vector<1x16x8xf32>
      tpu.vector_store %arg8[%c2_56, %c0_57, %c0_58], %86 {strides = array<i32>} : memref<4x16x8xf32, #tpu.memory_space<vmem>>, vector<1x16x8xf32>,
      %87 = vector.extract_strided_slice %58 {offsets = [0, 48], sizes = [16, 8], strides = [1, 1]} : vector<16x96xf32> to vector<16x8xf32>
      %c2_59 = arith.constant 2 : index
      %c0_60 = arith.constant 0 : index
      %c0_61 = arith.constant 0 : index
      %88 = vector.load %arg9[%c2_59, %c0_60, %c0_61] : memref<4x16x8xf32, #tpu.memory_space<vmem>>, vector<1x16x8xf32>
      %89 = vector.shape_cast %88 : vector<1x16x8xf32> to vector<16x8xf32>
      %90 = vector.shape_cast %87 : vector<16x8xf32> to vector<1x16x8xf32>
      tpu.vector_store %arg9[%c2_59, %c0_60, %c0_61], %90 {strides = array<i32>} : memref<4x16x8xf32, #tpu.memory_space<vmem>>, vector<1x16x8xf32>,
      %91 = vector.extract_strided_slice %58 {offsets = [0, 80], sizes = [16, 8], strides = [1, 1]} : vector<16x96xf32> to vector<16x8xf32>
      %c2_62 = arith.constant 2 : index
      %c0_63 = arith.constant 0 : index
      %c0_64 = arith.constant 0 : index
      %92 = vector.load %arg10[%c2_62, %c0_63, %c0_64] : memref<4x16x8xf32, #tpu.memory_space<vmem>>, vector<1x16x8xf32>
      %93 = vector.shape_cast %92 : vector<1x16x8xf32> to vector<16x8xf32>
      %94 = vector.shape_cast %91 : vector<16x8xf32> to vector<1x16x8xf32>
      tpu.vector_store %arg10[%c2_62, %c0_63, %c0_64], %94 {strides = array<i32>} : memref<4x16x8xf32, #tpu.memory_space<vmem>>, vector<1x16x8xf32>,
      %95 = vector.extract_strided_slice %58 {offsets = [0, 24], sizes = [16, 8], strides = [1, 1]} : vector<16x96xf32> to vector<16x8xf32>
      %c3_65 = arith.constant 3 : index
      %c0_66 = arith.constant 0 : index
      %c0_67 = arith.constant 0 : index
      %96 = vector.load %arg8[%c3_65, %c0_66, %c0_67] : memref<4x16x8xf32, #tpu.memory_space<vmem>>, vector<1x16x8xf32>
      %97 = vector.shape_cast %96 : vector<1x16x8xf32> to vector<16x8xf32>
      %98 = vector.shape_cast %95 : vector<16x8xf32> to vector<1x16x8xf32>
      tpu.vector_store %arg8[%c3_65, %c0_66, %c0_67], %98 {strides = array<i32>} : memref<4x16x8xf32, #tpu.memory_space<vmem>>, vector<1x16x8xf32>,
      %99 = vector.extract_strided_slice %58 {offsets = [0, 56], sizes = [16, 8], strides = [1, 1]} : vector<16x96xf32> to vector<16x8xf32>
      %c3_68 = arith.constant 3 : index
      %c0_69 = arith.constant 0 : index
      %c0_70 = arith.constant 0 : index
      %100 = vector.load %arg9[%c3_68, %c0_69, %c0_70] : memref<4x16x8xf32, #tpu.memory_space<vmem>>, vector<1x16x8xf32>
      %101 = vector.shape_cast %100 : vector<1x16x8xf32> to vector<16x8xf32>
      %102 = vector.shape_cast %99 : vector<16x8xf32> to vector<1x16x8xf32>
      tpu.vector_store %arg9[%c3_68, %c0_69, %c0_70], %102 {strides = array<i32>} : memref<4x16x8xf32, #tpu.memory_space<vmem>>, vector<1x16x8xf32>,
      %103 = vector.extract_strided_slice %58 {offsets = [0, 88], sizes = [16, 8], strides = [1, 1]} : vector<16x96xf32> to vector<16x8xf32>
      %c3_71 = arith.constant 3 : index
      %c0_72 = arith.constant 0 : index
      %c0_73 = arith.constant 0 : index
      %104 = vector.load %arg10[%c3_71, %c0_72, %c0_73] : memref<4x16x8xf32, #tpu.memory_space<vmem>>, vector<1x16x8xf32>
      %105 = vector.shape_cast %104 : vector<1x16x8xf32> to vector<16x8xf32>
      %106 = vector.shape_cast %103 : vector<16x8xf32> to vector<1x16x8xf32>
      tpu.vector_store %arg10[%c3_71, %c0_72, %c0_73], %106 {strides = array<i32>} : memref<4x16x8xf32, #tpu.memory_space<vmem>>, vector<1x16x8xf32>,
    } else {
    }
    %c16_i32 = arith.constant 16 : i32
    %3 = arith.muli %arg1, %c16_i32 : i32
    %4 = tpu.assume_multiple %3, 16 : i32
    %c0 = arith.constant 0 : index
    %5 = arith.index_cast %4 : i32 to index
    %c0_1 = arith.constant 0 : index
    %6 = vector.load %arg8[%c0, %5, %c0_1] : memref<4x16x8xf32, #tpu.memory_space<vmem>>, vector<4x16x8xf32>
    %c0_2 = arith.constant 0 : index
    %c0_3 = arith.constant 0 : index
    %c0_4 = arith.constant 0 : index
    %7 = vector.load %arg9[%c0_2, %c0_3, %c0_4] : memref<4x16x8xf32, #tpu.memory_space<vmem>>, vector<4x16x8xf32>
    %c0_5 = arith.constant 0 : index
    %c0_6 = arith.constant 0 : index
    %c0_7 = arith.constant 0 : index
    %8 = vector.load %arg10[%c0_5, %c0_6, %c0_7] : memref<4x16x8xf32, #tpu.memory_space<vmem>>, vector<4x16x8xf32>
    "tpu.trace_start"() <{level = 10 : i32, message = "hqd,hkd->hqk"}> : () -> ()
    %cst = arith.constant dense<0.000000e+00> : vector<4x16x16xf32>
    %9 = tpu.matmul %6, %7, %cst {dimension_numbers = #tpu.dot_dimension_numbers<[2], [2], [1], [1], [0, 0, 0, 1, 1, 1], [0], [0]>} : vector<4x16x8xf32>, vector<4x16x8xf32>, vector<4x16x16xf32> -> vector<4x16x16xf32>
    "tpu.trace_stop"() : () -> ()
    %cst_8 = arith.constant dense<0xFF800000> : vector<4x16xf32>
    %10 = vector.multi_reduction <maximumf>, %9, %cst_8 [2] : vector<4x16x16xf32> to vector<4x16xf32>
    %11 = vector.shape_cast %10 : vector<4x16xf32> to vector<4x16x1xf32>
    %12 = vector.broadcast %11 : vector<4x16x1xf32> to vector<4x16x16xf32>
    %13 = arith.subf %9, %12 : vector<4x16x16xf32>
    %14 = math.exp %13 : vector<4x16x16xf32>
    %cst_9 = arith.constant dense<0.000000e+00> : vector<4x16xf32>
    %15 = vector.multi_reduction <add>, %14, %cst_9 [2] : vector<4x16x16xf32> to vector<4x16xf32>
    %16 = vector.shape_cast %15 : vector<4x16xf32> to vector<4x16x1xf32>
    %17 = tpu.reciprocal %16 {approx = true} : vector<4x16x1xf32> -> vector<4x16x1xf32>
    %18 = vector.broadcast %17 : vector<4x16x1xf32> to vector<4x16x16xf32>
    %19 = arith.mulf %14, %18 : vector<4x16x16xf32>
    "tpu.trace_start"() <{level = 10 : i32, message = "hqk,hkd->hqd"}> : () -> ()
    %cst_10 = arith.constant dense<0.000000e+00> : vector<4x16x8xf32>
    %20 = tpu.matmul %19, %8, %cst_10 {dimension_numbers = #tpu.dot_dimension_numbers<[2], [1], [1], [2], [0, 0, 0, 1, 1, 2], [0], [0]>} : vector<4x16x16xf32>, vector<4x16x8xf32>, vector<4x16x8xf32> -> vector<4x16x8xf32>
    %cst_11 = arith.constant 0.000000e+00 : f32
    "tpu.trace_stop"() : () -> ()
    %21 = vector.broadcast %cst_11 : f32 to vector<16x128xf32>
    %22 = vector.extract_strided_slice %20 {offsets = [0, 0, 0], sizes = [1, 16, 8], strides = [1, 1, 1]} : vector<4x16x8xf32> to vector<1x16x8xf32>
    %23 = vector.shape_cast %22 : vector<1x16x8xf32> to vector<16x8xf32>
    %c0_12 = arith.constant 0 : index
    %c0_13 = arith.constant 0 : index
    %c0_14 = arith.constant 0 : index
    %24 = vector.load %arg5[%c0_12, %c0_13, %c0_14] : memref<4x8x128xf32, #tpu.memory_space<vmem>>, vector<1x8x128xf32>
    %25 = vector.shape_cast %24 : vector<1x8x128xf32> to vector<8x128xf32>
    %cst_15 = arith.constant dense<0.000000e+00> : vector<16x128xf32>
    %26 = tpu.matmul %23, %25, %cst_15 {dimension_numbers = #tpu.dot_dimension_numbers<[1], [0], [0], [1], [0, 0, 1, 1], [], []>} : vector<16x8xf32>, vector<8x128xf32>, vector<16x128xf32> -> vector<16x128xf32>
    %27 = arith.addf %21, %26 : vector<16x128xf32>
    %28 = vector.extract_strided_slice %20 {offsets = [1, 0, 0], sizes = [1, 16, 8], strides = [1, 1, 1]} : vector<4x16x8xf32> to vector<1x16x8xf32>
    %29 = vector.shape_cast %28 : vector<1x16x8xf32> to vector<16x8xf32>
    %c1 = arith.constant 1 : index
    %c0_16 = arith.constant 0 : index
    %c0_17 = arith.constant 0 : index
    %30 = vector.load %arg5[%c1, %c0_16, %c0_17] : memref<4x8x128xf32, #tpu.memory_space<vmem>>, vector<1x8x128xf32>
    %31 = vector.shape_cast %30 : vector<1x8x128xf32> to vector<8x128xf32>
    %cst_18 = arith.constant dense<0.000000e+00> : vector<16x128xf32>
    %32 = tpu.matmul %29, %31, %cst_18 {dimension_numbers = #tpu.dot_dimension_numbers<[1], [0], [0], [1], [0, 0, 1, 1], [], []>} : vector<16x8xf32>, vector<8x128xf32>, vector<16x128xf32> -> vector<16x128xf32>
    %33 = arith.addf %27, %32 : vector<16x128xf32>
    %34 = vector.extract_strided_slice %20 {offsets = [2, 0, 0], sizes = [1, 16, 8], strides = [1, 1, 1]} : vector<4x16x8xf32> to vector<1x16x8xf32>
    %35 = vector.shape_cast %34 : vector<1x16x8xf32> to vector<16x8xf32>
    %c2 = arith.constant 2 : index
    %c0_19 = arith.constant 0 : index
    %c0_20 = arith.constant 0 : index
    %36 = vector.load %arg5[%c2, %c0_19, %c0_20] : memref<4x8x128xf32, #tpu.memory_space<vmem>>, vector<1x8x128xf32>
    %37 = vector.shape_cast %36 : vector<1x8x128xf32> to vector<8x128xf32>
    %cst_21 = arith.constant dense<0.000000e+00> : vector<16x128xf32>
    %38 = tpu.matmul %35, %37, %cst_21 {dimension_numbers = #tpu.dot_dimension_numbers<[1], [0], [0], [1], [0, 0, 1, 1], [], []>} : vector<16x8xf32>, vector<8x128xf32>, vector<16x128xf32> -> vector<16x128xf32>
    %39 = arith.addf %33, %38 : vector<16x128xf32>
    %40 = vector.extract_strided_slice %20 {offsets = [3, 0, 0], sizes = [1, 16, 8], strides = [1, 1, 1]} : vector<4x16x8xf32> to vector<1x16x8xf32>
    %41 = vector.shape_cast %40 : vector<1x16x8xf32> to vector<16x8xf32>
    %c3 = arith.constant 3 : index
    %c0_22 = arith.constant 0 : index
    %c0_23 = arith.constant 0 : index
    %42 = vector.load %arg5[%c3, %c0_22, %c0_23] : memref<4x8x128xf32, #tpu.memory_space<vmem>>, vector<1x8x128xf32>
    %43 = vector.shape_cast %42 : vector<1x8x128xf32> to vector<8x128xf32>
    %cst_24 = arith.constant dense<0.000000e+00> : vector<16x128xf32>
    %44 = tpu.matmul %41, %43, %cst_24 {dimension_numbers = #tpu.dot_dimension_numbers<[1], [0], [0], [1], [0, 0, 1, 1], [], []>} : vector<16x8xf32>, vector<8x128xf32>, vector<16x128xf32> -> vector<16x128xf32>
    %45 = arith.addf %39, %44 : vector<16x128xf32>
    %c0_25 = arith.constant 0 : index
    %c0_26 = arith.constant 0 : index
    %46 = vector.load %arg6[%c0_25, %c0_26] : memref<1x128xf32, #tpu.memory_space<vmem>>, vector<1x128xf32>
    %47 = vector.broadcast %46 : vector<1x128xf32> to vector<16x128xf32>
    %48 = arith.addf %45, %47 : vector<16x128xf32>
    %c0_27 = arith.constant 0 : index
    %c0_28 = arith.constant 0 : index
    %c0_29 = arith.constant 0 : index
    %49 = vector.load %arg7[%c0_27, %c0_28, %c0_29] : memref<1x16x128xf32, #tpu.memory_space<vmem>>, vector<1x16x128xf32>
    %50 = vector.shape_cast %49 : vector<1x16x128xf32> to vector<16x128xf32>
    %51 = vector.shape_cast %48 : vector<16x128xf32> to vector<1x16x128xf32>
    tpu.vector_store %arg7[%c0_27, %c0_28, %c0_29], %51 {strides = array<i32>} : memref<1x16x128xf32, #tpu.memory_space<vmem>>, vector<1x16x128xf32>,
    return
  }
  func.func @transform_0(%arg0: i32, %arg1: i32) -> (i32, i32, i32) {
    %c0_i32 = arith.constant 0 : i32
    %c0_i32_0 = arith.constant 0 : i32
    %c0_i32_1 = arith.constant 0 : i32
    return %arg0, %c0_i32, %c0_i32_0 : i32, i32, i32
  }
  func.func @transform_1(%arg0: i32, %arg1: i32) -> (i32, i32) {
    %c0_i32 = arith.constant 0 : i32
    %c0_i32_0 = arith.constant 0 : i32
    %c0_i32_1 = arith.constant 0 : i32
    return %c0_i32, %c0_i32_0 : i32, i32
  }
  func.func @transform_2(%arg0: i32, %arg1: i32) -> (i32, i32) {
    %c0_i32 = arith.constant 0 : i32
    %c0_i32_0 = arith.constant 0 : i32
    %c0_i32_1 = arith.constant 0 : i32
    return %c0_i32, %c0_i32_0 : i32, i32
  }
  func.func @transform_3(%arg0: i32, %arg1: i32) -> (i32, i32, i32) {
    %c0_i32 = arith.constant 0 : i32
    %c0_i32_0 = arith.constant 0 : i32
    %c0_i32_1 = arith.constant 0 : i32
    %c0_i32_2 = arith.constant 0 : i32
    return %c0_i32, %c0_i32_0, %c0_i32_1 : i32, i32, i32
  }
  func.func @transform_4(%arg0: i32, %arg1: i32) -> (i32, i32) {
    %c0_i32 = arith.constant 0 : i32
    %c0_i32_0 = arith.constant 0 : i32
    %c0_i32_1 = arith.constant 0 : i32
    return %c0_i32, %c0_i32_0 : i32, i32
  }
  func.func @transform_5(%arg0: i32, %arg1: i32) -> (i32, i32, i32) {
    %c0_i32 = arith.constant 0 : i32
    %c0_i32_0 = arith.constant 0 : i32
    return %arg0, %arg1, %c0_i32 : i32, i32, i32
  }
}

</mosaic_0001>

<bundles_post_ra>
// kernel: tpu_custom_call.1
= control target key start
LH: loop header
LB: loop body
LE: loop exit
PB: predicated region body
PF: predicated region fallthrough
CT: control target
= control target key end

     0   :  { %s1752_s0 = inlined_call_operand.hbm [shape: f32[2,16,32], index: 0, kind: input, shape index: {}]   ;;  %s1753_s1 = inlined_call_operand.hbm [shape: f32[32,96], index: 1, kind: input, shape index: {}]   ;;  %s1754_s2 = inlined_call_operand.vmem [shape: f32[1,96], index: 2, kind: input, shape index: {}]   ;;  %s1755_s3 = inlined_call_operand.hbm [shape: f32[4,8,128], index: 3, kind: input, shape index: {}]   ;;  %s1756_s4 = inlined_call_operand.vmem [shape: f32[1,128], index: 4, kind: input, shape index: {}]   ;;  %s1757_s5 = inlined_call_operand.hbm [shape: f32[2,16,128], index: 5, kind: output, shape index: {}]  }
   0x1   :  { %1760 = sst [smem:[#allocation15_spill]] %s1753_s1 }
   0x2   :  { %1761 = sst [smem:[#allocation16_spill]] %s1755_s3 }
   0x3   :  { %10 = vsyncpa [#allocation6], 0 }
   0x4   :  { %12 = vsyncpa [#allocation6 + $0x1], 0 }
   0x5   :  { %13 = vsyncpa [#allocation9], 0 }
   0x6   :  { %14 = vsyncpa [#allocation7], 0 }
   0x7   :  { %16 = vsyncpa [#allocation7 + $0x1], 0  ;;  %s1485_s18 = smov 0   ;;  %s1487_s19 = smov 0  }
   0x8   :  { %s1489_s20 = smov 0   ;;  %s1491_s21 = smov 0  }
   0x9   :  { %s1493_s22 = smov 0   ;;  %s1495_s23 = smov 0  }
   0xa LB: > { %s1069_s24 = sadd.s32 4294967295, %s1436_s23   ;;  %s1070_s25 = sadd.s32 4294967294, %s1436_s23   ;;  %s1436_s23 = sphi %s1495_s23, %s22_s23   ;;  %s1432_s22 = sphi %s1493_s22, %s1775_s22   ;;  %s1428_s21 = sphi %s1491_s21, %s1774_s21   ;;  %s1424_s20 = sphi %s1489_s20, %s1773_s20   ;;  %s1420_s19 = sphi %s1487_s19, %s1772_s19   ;;  %s1416_s18 = sphi %s1485_s18, %s1771_s18  }
   0xb   : > { %p54_p0 = scmp.ne.s32.totalorder %s1420_s19, %s1416_s18  ;;  %p1521_p1 = scmp.eq.s32.totalorder %s1069_s24, 0 }
   0xc   : > { %p170_p2 = scmp.eq.s32.totalorder %s1070_s25, 1  ;;  %p1071_p4 = scmp.ge.s32.totalorder %s1436_s23, 1 }
   0xd   : > { %p1527_p3 = por %p1521_p1, %p54_p0  ;;  %p177_p6 = scmp.lt.s32.totalorder %s1436_s23, 3 }
   0xe   : > { %p1532_p5 = por %p170_p2, %p54_p0  ;;  %s1765_s1 = sld [smem:[#allocation15_spill]] }
   0xf   : > { %p1540_p7 = pnand %p1071_p4, %p177_p6  ;;  %s1438_s8 = smov [#allocation8]  }
  0x10   : > { %s190_s9 = sshll.u32 %s1438_s8, 4  ;;  %p1074_p10 = scmp.ge.s32.totalorder %s1436_s23, 2  ;;  %s191_s9 = int_to_ptr.vmem [resolvable:$true] %s190_s9 }
  0x11   : > { %p1140_p8 = pneg %p1540_p7  ;;  %s1767_s3 = sld [smem:[#allocation16_spill]] }
  0x12   : > { %s1758_s13 = smov 128   ;;  %s1759_s14 = smov 8  }
  0x13   : > { %p1141_p9 = pnand %p1140_p8, %p1521_p1  ;;  %s1441_s15 = smov [#allocation10]  }
  0x14   : > { %s188_s6 = sshll.u32 %s1765_s1, 4  ;;  %s207_s16 = sshll.u32 %s1441_s15, 4  ;;  %s189_s6 = int_to_ptr.hbm [resolvable:$true] %s188_s6  ;;  %s208_s16 = int_to_ptr.vmem [resolvable:$true] %s207_s16 }
  0x15   : > { %1143 = dma.hbm_to_vmem [thread:$0]  (!%p1141_p9), %s189_s6, 512, %s191_s9, [#allocation9], %s1758_s13, %s1758_s13, %s1759_s14  }
  0x16   : > { %p164_p11 = scmp.eq.s32.totalorder %s1069_s24, 1  ;;  %s34_s17 = sadd.s32 1, %s1432_s22 }
  0x17   : > { %s205_s12 = sshll.u32 %s1767_s3, 4  ;;  %p36_p12 = scmp.ge.s32.totalorder %s34_s17, 2  ;;  %s206_s12 = int_to_ptr.hbm [resolvable:$true] %s205_s12 }
  0x18   : > { %1146 = dma.hbm_to_vmem [thread:$0]  (!%p1141_p9), %s206_s12, 512, %s208_s16, [#allocation9], %s1758_s13, %s1758_s13, %s1759_s14  }
  0x19   : > { %s41_s25 = sadd.s32 1, %s1424_s20  ;;  %p48_p13 = scmp.ne.s32.totalorder %s1424_s20, %s1420_s19 }
  0x1a   : > { %p49_p0 = scmp.eq.s32.totalorder %s1436_s23, 0  ;;  %s1777_s17 = smov (%p36_p12, %s34_s17), 0 }
  0x1b   : > { %p1567_p2 = por %p164_p11, %p48_p13  ;;  %p1157_p4 = scmp.lt.s32.totalorder %s1436_s23, 2 }
  0x1c   : > { %s38_s30 = ssub.s32 %s1432_s22, %s1777_s17  ;;  %s224_s6 = sand.u32 1, %s1424_s20  }
  0x1d   : > { %p39_p6 = scmp.eq.s32.totalorder %s38_s30, 0  ;;  %p50_p8 = por %p49_p0, %p48_p13 }
  0x1e   : > { %s1075_s8 = sshll.u32 %s224_s6, 4  ;;  %s1122_s24 = sshll.u32 %s1432_s22, 4 }
  0x1f   : > { %s1577_s9 = scalar_select %p39_p6, %s1424_s20, %s41_s25  }
  0x20   : > { %s233_s12 = scalar_lea.hbm %s1752_s0, %s1122_s24  ;;  %s228_s16 = scalar_lea.vmem [#allocation5], %s1075_s8 }
  0x21   : > { %s234_s15 = sshll.u32 %s233_s12, 4  ;;  %s236_s13 = sshll.u32 %s228_s16, 4  ;;  %s235_s15 = int_to_ptr.hbm [resolvable:$true] %s234_s15  ;;  %s237_s13 = int_to_ptr.vmem [resolvable:$true] %s236_s13 }
  0x22   : > { %p1148_p9 = pnand %p1157_p4, %p50_p8  ;;  %s225_s14 = scalar_lea.sflag [#allocation6], %s224_s6 }
  0x23   : > { %s1769_s1 = smov 8   ;;  %s1770_s3 = smov 128  }
  0x24   : > { %1150 = dma.hbm_to_vmem [thread:$0]  (!%p1148_p9), %s235_s15, 256, %s237_s13, %s225_s14, %s1770_s3, %s1770_s3, %s1769_s1  }
  0x25   : > { %248 = sbr.rel (%p1540_p7) target bundleno = 1016 (0x3f8), region = 40  ;;  %s1590_s25 = sand.u32 (!%p1540_p7), 1, %s1420_s19  }
  0x26   : > { %s1079_s30 = sshll.u32 (!%p1540_p7), %s1590_s25, 4  ;;  %s251_s8 = scalar_lea.sflag (!%p1540_p7), [#allocation6], %s1590_s25 }
  0x27   : > { %s254_s24 = scalar_lea.vmem (!%p1540_p7), [#allocation5], %s1079_s30 }
  0x2a   : > { %1403 = dma.done.wait (%p1527_p3), %s251_s8, 256  }
  0x2b   : > { %1405 = vsyncadd (%p1527_p3), %s251_s8, 4294967040 }
  0x2c   : > { %1407 = dma.done.wait (%p1521_p1), [#allocation9], 1024  }
  0x2d   : > { %1409 = vsyncadd (%p1521_p1), [#allocation9], 4294966272  ;;  %v302_v0 = vld [vmem:[#allocation8 + $0x18] sm:$0xff]  ;;  %v301_v1 = vld [vmem:[#allocation8 + $0x10] sm:$0xff]  ;;  %vm307_vm0 = vcmask 261120   ;;  %vm337_vm1 = vcmask 64512  }
  0x2e   : > { %326 = vmatpush.msra.mxu0 %v302_v0  ;;  %1124 = vmatpush.msra.mxu1 %v302_v0  ;;  %v300_v2 = vld [vmem:[#allocation8 + $0x8] sm:$0xff]  ;;  %v299_v3 = vld [vmem:[#allocation8] sm:$0xff]  ;;  %s1442_s26 = smov 80   ;;  %s1443_s27 = smov 88   ;;  %vm606_vm2 = vcmask 130048  }
  0x2f   : > { %v297_v4 = vld [vmem:[%s254_s24] sm:$0xff]  ;;  %v298_v5 = vld [vmem:[%s254_s24 + $0x8] sm:$0xff]  ;;  %s1444_s7 = smov 96   ;;  %s1445_s13 = smov 112  }
  0x30   : > { %327 = vmatpush.msra.mxu0 %v301_v1  ;;  %1125 = vmatpush.msra.mxu1 %v301_v1  ;;  %v1226_v6 = vld [vmem:[%s1754_s2] ss:$0 sm:$0xff]  ;;  %s1446_s14 = smov 120   ;;  %s1447_s6 = smov 72  }
  0x31   : > { %s1448_s10 = smov 104   ;;  %s1449_s11 = smov 48  }
  0x32   : > { %328 = vmatpush.msra.mxu0 %v300_v2  ;;  %1126 = vmatpush.msra.mxu1 %v300_v2  ;;  %s1450_s12 = smov 64   ;;  %s1451_s15 = smov 56  }
  0x33   : > { %s1452_s16 = smov 40   ;;  %s1123_s1 = sshll.u32 %s1428_s21, 4 }
  0x34   : > { %329 = vmatpush.msra.mxu0 %v299_v3  ;;  %1127 = vmatpush.msra.mxu1 %v299_v3  ;;  %s291_s3 = scalar_lea.vmem [#allocation11], %s1079_s30  ;;  %s947_s21 = scalar_lea.sflag [#allocation7], %s1590_s25 }
  0x35   : > { %1083 = vmatmul.msk.f32.vlgmr.msra.gmra.mxu0 %vm307_vm0, %v297_v4  ;;  %1084 = vmatmul.msk.f32.vlgmr.msra.gmra.mxu1 %vm307_vm0, %v298_v5 }
  0xb2   : > { %v331_v7 = vpop.f32.mrf.mxu0  ;;  %v334_v8 = vpop.f32.mrf.mxu1 }
  0xb3   : > { %v1607_v9 = vadd.f32 %v1226_v6, %v331_v7  ;;  %v1609_v10 = vadd.f32 %v1226_v6, %v334_v8 }
  0xb5   : > { %396 = vrot.lane.b32.xlu0 %v1609_v10, %s1442_s26  ;;  %367 = vrot.lane.b32.xlu2 %v1607_v9, %s1443_s27  ;;  %338 = vst.msk [vmem:[#allocation2] sm:$0xff] %vm337_vm1, %v1607_v9 }
  0xb6   : > { %394 = vrot.lane.b32.xlu1 %v1607_v9, %s1442_s26  ;;  %339 = vst.msk [vmem:[#allocation2 + $0x8] sm:$0xff] %vm337_vm1, %v1609_v10 }
  0xbc   : > { %v441_v33 = vld [vmem:[#allocation2] sm:$0xff] }
  0xbd   : > { %369 = vrot.lane.b32.xlu0 %v1609_v10, %s1443_s27  ;;  %344 = vrot.lane.b32.xlu2 %v1609_v10, %s1444_s7  ;;  %v442_v38 = vld [vmem:[#allocation2 + $0x8] sm:$0xff] }
  0xbe   : > { %385 = vrot.lane.b32.xlu1 %v1607_v9, %s1445_s13 }
  0xc5   : > { %358 = vrot.lane.b32.xlu0 %v1607_v9, %s1446_s14  ;;  %387 = vrot.lane.b32.xlu2 %v1609_v10, %s1445_s13  ;;  %s961_s13 = sshll.u32 %s291_s3, 4  ;;  %s962_s13 = int_to_ptr.vmem [resolvable:$true] %s961_s13 }
  0xc6   : > { %342 = vrot.lane.b32.xlu1 %v1607_v9, %s1444_s7  ;;  %s960_s7 = scalar_lea.hbm %s1757_s5, %s1123_s1 }
  0xcd   : > { %360 = vrot.lane.b32.xlu0 %v1609_v10, %s1446_s14  ;;  %421 = vrot.lane.b32.xlu2 %v1607_v9, %s1447_s6  ;;  %s963_s14 = sshll.u32 %s960_s7, 4  ;;  %s964_s14 = int_to_ptr.hbm [resolvable:$true] %s963_s14 }
  0xce   : > { %423 = vrot.lane.b32.xlu1 %v1609_v10, %s1447_s6  ;;  %s1364_s6 = sshra.s32 %s964_s14, 4  ;;  %s1365_s6 = int_to_ptr.hbm [resolvable:$true] %s1364_s6 }
  0xcf   : > { %s1366_s30 = scalar_lea.hbm %s1365_s6, 16  ;;  %p1371_p11 = scmp.lt.s32.totalorder %s1365_s6, %s1757_s5 }
  0xd0   : > { %p1367_p1 = scmp.ne.s32.totalorder %s1365_s6, %s1366_s30 }
  0xd2   : > { %p1368_p3 = pnand %p1367_p1, %p1567_p2 }
  0xd4   : > { %p1369_p7 = pneg %p1368_p3 }
  0xd5   : > { %412 = vrot.lane.b32.xlu0 %v1607_v9, %s1448_s10  ;;  %403 = vrot.lane.b32.xlu2 %v1607_v9, %s1449_s11 }
  0xd6   : > { %414 = vrot.lane.b32.xlu1 %v1609_v10, %s1448_s10 }
  0xdd   : > { %405 = vrot.lane.b32.xlu0 %v1609_v10, %s1449_s11 }
  0xde   : > { %352 = vrot.lane.b32.xlu1 %v1609_v10, %s1450_s12 }
  0xe5   : > { %378 = vrot.lane.b32.xlu0 %v1609_v10, %s1451_s15 }
  0xe6   : > { %350 = vrot.lane.b32.xlu1 %v1607_v9, %s1450_s12  ;;  %s1370_s12 = scalar_lea.hbm %s1757_s5, 32 }
  0xe7   : > { %p1372_p12 = scmp.lt.s32.totalorder %s1370_s12, %s1366_s30 }
  0xe9   : > { %p1373_p13 = por %p1372_p12, %p1371_p11 }
  0xeb   : > { %p1374_p0 = pnand %p1373_p13, %p1369_p7 }
 0x10f   : > { %v368_v11 = vpop.permute.xlu2 %367 }
 0x110   : > { %374 = vst.msk [vmem:[#allocation3 + $0x10] sm:$0xff] %vm337_vm1, %v368_v11 }
 0x117   : > { %v345_v12 = vpop.permute.xlu2 %344  ;;  %v451_v27 = vld [vmem:[#allocation3 + $0x10] sm:$0xff] }
 0x118   : > { %349 = vst.msk [vmem:[#allocation3 + $0x8] sm:$0xff] %vm337_vm1, %v345_v12 }
 0x11f   : > { %v388_v13 = vpop.permute.xlu2 %387  ;;  %v450_v14 = vld [vmem:[#allocation3 + $0x8] sm:$0xff] }
 0x120   : > { %393 = vst.msk [vmem:[#allocation2 + $0x28] sm:$0xff] %vm337_vm1, %v388_v13  ;;  %1085 = vmatpush.xpose.msk.msrb.mxu1 %vm337_vm1, %v450_v14 }
 0x127   : > { %v397_v15 = vpop.permute.xlu0 %396  ;;  %v422_v16 = vpop.permute.xlu2 %421  ;;  %v446_v32 = vld [vmem:[#allocation2 + $0x28] sm:$0xff] }
 0x128   : > { %402 = vst.msk [vmem:[#allocation3 + $0x28] sm:$0xff] %vm337_vm1, %v397_v15  ;;  %v395_v17 = vpop.permute.xlu1 %394 }
 0x129   : > { %428 = vst.msk [vmem:[#allocation3 + $0x30] sm:$0xff] %vm337_vm1, %v422_v16 }
 0x12a   : > { %401 = vst.msk [vmem:[#allocation3 + $0x20] sm:$0xff] %vm337_vm1, %v395_v17 }
 0x12f   : > { %v370_v18 = vpop.permute.xlu0 %369  ;;  %v404_v19 = vpop.permute.xlu2 %403  ;;  %v454_v20 = vld [vmem:[#allocation3 + $0x28] sm:$0xff] }
 0x130   : > { %375 = vst.msk [vmem:[#allocation3 + $0x18] sm:$0xff] %vm337_vm1, %v370_v18  ;;  %v386_v21 = vpop.permute.xlu1 %385  ;;  %1093 = vmatpush.xpose.msk.msra.mxu3 %vm337_vm1, %v454_v20  ;;  %v455_v39 = vld [vmem:[#allocation3 + $0x30] sm:$0xff] }
 0x131   : > { %410 = vst.msk [vmem:[#allocation4 + $0x20] sm:$0xff] %vm337_vm1, %v404_v19  ;;  %v453_v22 = vld [vmem:[#allocation3 + $0x20] sm:$0xff] }
 0x132   : > { %392 = vst.msk [vmem:[#allocation2 + $0x20] sm:$0xff] %vm337_vm1, %v386_v21 }
 0x134   : > { %1094 = vmatpush.xpose.msk.msra.mxu3 %vm337_vm1, %v453_v22 }
 0x137   : > { %v359_v23 = vpop.permute.xlu0 %358  ;;  %v452_v24 = vld [vmem:[#allocation3 + $0x18] sm:$0xff] }
 0x138   : > { %365 = vst.msk [vmem:[#allocation2 + $0x10] sm:$0xff] %vm337_vm1, %v359_v23  ;;  %v343_v25 = vpop.permute.xlu1 %342  ;;  %1089 = vmatpush.xpose.msk.msra.mxu2 %vm337_vm1, %v452_v24  ;;  %v461_v48 = vld [vmem:[#allocation4 + $0x20] sm:$0xff] }
 0x139   : > { %348 = vst.msk [vmem:[#allocation3] sm:$0xff] %vm337_vm1, %v343_v25  ;;  %v445_v26 = vld [vmem:[#allocation2 + $0x20] sm:$0xff] }
 0x13a   : > { %1095 = vmatmul.msk.f32.vlgmr.msra.gmra.mxu3 %vm337_vm1, %v445_v26 }
 0x13c   : > { %1090 = vmatpush.xpose.msk.msra.mxu2 %vm337_vm1, %v451_v27 }
 0x13f   : > { %v361_v28 = vpop.permute.xlu0 %360  ;;  %v443_v29 = vld [vmem:[#allocation2 + $0x10] sm:$0xff] }
 0x140   : > { %366 = vst.msk [vmem:[#allocation2 + $0x18] sm:$0xff] %vm337_vm1, %v361_v28  ;;  %v424_v30 = vpop.permute.xlu1 %423  ;;  %v449_v31 = vld [vmem:[#allocation3] sm:$0xff]  ;;  %1091 = vmatmul.msk.f32.vlgmr.msra.gmra.mxu2 %vm337_vm1, %v443_v29 }
 0x141   : > { %429 = vst.msk [vmem:[#allocation3 + $0x38] sm:$0xff] %vm337_vm1, %v424_v30  ;;  %1086 = vmatpush.xpose.msk.msrb.mxu1 %vm337_vm1, %v449_v31 }
 0x142   : > { %1096 = vmatmul.msk.f32.gmra.mxu3 %vm337_vm1, %v446_v32 }
 0x144   : > { %1087 = vmatmul.msk.f32.vlgmr.msrb.gmra.mxu1 %vm337_vm1, %v441_v33 }
 0x147   : > { %v413_v34 = vpop.permute.xlu0 %412  ;;  %v444_v35 = vld [vmem:[#allocation2 + $0x18] sm:$0xff] }
 0x148   : > { %419 = vst.msk [vmem:[#allocation2 + $0x30] sm:$0xff] %vm337_vm1, %v413_v34  ;;  %v415_v36 = vpop.permute.xlu1 %414  ;;  %1092 = vmatmul.msk.f32.gmra.mxu2 %vm337_vm1, %v444_v35  ;;  %v456_v37 = vld [vmem:[#allocation3 + $0x38] sm:$0xff] }
 0x149   : > { %420 = vst.msk [vmem:[#allocation2 + $0x38] sm:$0xff] %vm337_vm1, %v415_v36  ;;  %1097 = vmatpush.xpose.msk.msrb.mxu0 %vm337_vm1, %v456_v37 }
 0x14c   : > { %1088 = vmatmul.msk.f32.gmra.mxu1 %vm337_vm1, %v442_v38 }
 0x14d   : > { %1098 = vmatpush.xpose.msk.msrb.mxu0 %vm337_vm1, %v455_v39 }
 0x14f   : > { %v406_v40 = vpop.permute.xlu0 %405  ;;  %v447_v41 = vld [vmem:[#allocation2 + $0x30] sm:$0xff] }
 0x150   : > { %411 = vst.msk [vmem:[#allocation4 + $0x28] sm:$0xff] %vm337_vm1, %v406_v40  ;;  %v353_v42 = vpop.permute.xlu1 %352  ;;  %1099 = vmatmul.msk.f32.vlgmr.msrb.gmra.mxu0 %vm337_vm1, %v447_v41  ;;  %v448_v44 = vld [vmem:[#allocation2 + $0x38] sm:$0xff] }
 0x151   : > { %357 = vst.msk [vmem:[#allocation4 + $0x8] sm:$0xff] %vm337_vm1, %v353_v42 }
 0x157   : > { %v379_v43 = vpop.permute.xlu0 %378  ;;  %v462_v45 = vld [vmem:[#allocation4 + $0x28] sm:$0xff] }
 0x158   : > { %384 = vst.msk [vmem:[#allocation4 + $0x18] sm:$0xff] %vm337_vm1, %v379_v43  ;;  %v351_v46 = vpop.permute.xlu1 %350  ;;  %1100 = vmatmul.msk.f32.gmra.mxu0 %vm337_vm1, %v448_v44  ;;  %v458_v47 = vld [vmem:[#allocation4 + $0x8] sm:$0xff]  ;;  %773 = vmatpush.msrb.mxu3 %v462_v45 }
 0x159   : > { %356 = vst.msk [vmem:[#allocation4] sm:$0xff] %vm337_vm1, %v351_v46  ;;  %715 = vmatpush.msra.mxu1 %v458_v47 }
 0x15a   : > { %774 = vmatpush.msrb.mxu3 %v461_v48 }
 0x15f   : > { %v460_v49 = vld [vmem:[#allocation4 + $0x18] sm:$0xff] }
 0x160   : > { %v457_v50 = vld [vmem:[#allocation4] sm:$0xff]  ;;  %744 = vmatpush.msrb.mxu2 %v460_v49 }
 0x161   : > { %716 = vmatpush.msra.mxu1 %v457_v50 }
 0x1bd   : > { %v565_v51 = vpop.f32.mrf.mxu3 }
 0x1be   : > { %v619_v52 = vsel %vm606_vm2, %v565_v51, -inf }
 0x1bf   : > { %620 = vmax.xlane.f32.xlu2 %v619_v52 }
 0x1c1   : > { %v495_v53 = vpop.f32.mrf.mxu1 }
 0x1c2   : > { %v607_v54 = vsel %vm606_vm2, %v495_v53, -inf }
 0x1c3   : > { %608 = vmax.xlane.f32.xlu0 %v607_v54  ;;  %v530_v55 = vpop.f32.mrf.mxu2 }
 0x1c4   : > { %v613_v63 = vsel %vm606_vm2, %v530_v55, -inf }
 0x1c5   : > { %v568_v1 = vpop.f32.mrf.mxu3 }
 0x1c6   : > { %v622_v2 = vsel %vm606_vm2, %v568_v1, -inf }
 0x1c9   : > { %v498_v56 = vpop.f32.mrf.mxu1 }
 0x1ca   : > { %v610_v57 = vsel %vm606_vm2, %v498_v56, -inf }
 0x1cb   : > { %611 = vmax.xlane.f32.xlu2 %v610_v57  ;;  %v533_v58 = vpop.f32.mrf.mxu2 }
 0x1cc   : > { %v616_v59 = vsel %vm606_vm2, %v533_v58, -inf }
 0x1cd   : > { %v600_v60 = vpop.f32.mrf.mxu0  ;;  %617 = vmax.xlane.f32.xlu0 %v616_v59 }
 0x1ce   : > { %v625_v61 = vsel %vm606_vm2, %v600_v60, -inf }
 0x1cf   : > { %626 = vmax.xlane.f32.xlu1 %v625_v61 }
 0x1d5   : > { %v603_v62 = vpop.f32.mrf.mxu0 }
 0x1d6   : > { %v628_v0 = vsel %vm606_vm2, %v603_v62, -inf }
 0x1d7   : > { %614 = vmax.xlane.f32.xlu1 %v613_v63  ;;  %629 = vmax.xlane.f32.xlu2 %v628_v0 }
 0x1df   : > { %623 = vmax.xlane.f32.xlu2 %v622_v2 }
 0x1f0   : > { %376 = vrot.lane.b32.xlu1 %v1607_v9, %s1451_s15 }
 0x232   : > { %v621_v3 = vpop.xlane.xlu2 %620 }
 0x233   : > { %v635_v4 = vsub.f32 %v565_v51, %v621_v3 }
 0x235   : > { %v647_v5 = vmul.f32 1.442695, %v635_v4 }
 0x236   : > { %v609_v6 = vpop.xlane.xlu0 %608 }
 0x237   : > { %1228 = vpow2.f32 %v647_v5  ;;  %v631_v7 = vsub.f32 %v495_v53, %v609_v6 }
 0x239   : > { %v639_v8 = vmul.f32 1.442695, %v631_v7 }
 0x23b   : > { %1230 = vpow2.f32 %v639_v8 }
 0x23d   : > { %v1229_v11 = vpop.eup %1228 }
 0x23e   : > { %v667_v12 = vsel %vm606_vm2, %v1229_v11, 0.0  ;;  %v612_v13 = vpop.xlane.xlu2 %611 }
 0x23f   : > { %668 = vadd.xlane.f32.xlu1 %v667_v12  ;;  %v632_v14 = vsub.f32 %v498_v56, %v612_v13  ;;  %v873_v12 = vld [vmem:[#allocation10 + $0x10] sm:$0xff]  ;;  %v813_v13 = vld [vmem:[#allocation10 + $0x8] sm:$0xff] }
 0x240   : > { %v618_v27 = vpop.xlane.xlu0 %617  ;;  %895 = vmatpush.msra.mxu3 %v873_v12  ;;  %835 = vmatpush.msrb.mxu1 %v813_v13 }
 0x241   : > { %v1231_v15 = vpop.eup %1230  ;;  %v641_v16 = vmul.f32 1.442695, %v632_v14  ;;  %v634_v31 = vsub.f32 %v533_v58, %v618_v27 }
 0x242   : > { %v627_v17 = vpop.xlane.xlu1 %626  ;;  %v655_v18 = vsel %vm606_vm2, %v1231_v15, 0.0 }
 0x243   : > { %1232 = vpow2.f32 %v641_v16  ;;  %656 = vadd.xlane.f32.xlu0 %v655_v18  ;;  %v637_v24 = vsub.f32 %v600_v60, %v627_v17  ;;  %v645_v35 = vmul.f32 1.442695, %v634_v31  ;;  %v906_v16 = vld [vmem:[#allocation10 + $0x18] sm:$0xff] }
 0x245   : > { %v651_v26 = vmul.f32 1.442695, %v637_v24 }
 0x249   : > { %v1233_v19 = vpop.eup %1232 }
 0x24a   : > { %v615_v20 = vpop.xlane.xlu1 %614  ;;  %v658_v21 = vsel %vm606_vm2, %v1233_v19, 0.0  ;;  %v630_v22 = vpop.xlane.xlu2 %629 }
 0x24b   : > { %v633_v23 = vsub.f32 %v530_v55, %v615_v20  ;;  %659 = vadd.xlane.f32.xlu0 %v658_v21  ;;  %v638_v33 = vsub.f32 %v603_v62, %v630_v22 }
 0x24d   : > { %v643_v25 = vmul.f32 1.442695, %v633_v23  ;;  %v653_v36 = vmul.f32 1.442695, %v638_v33 }
 0x24f   : > { %1234 = vpow2.f32 %v643_v25 }
 0x250   : > { %1236 = vpow2.f32 %v651_v26 }
 0x252   : > { %v624_v28 = vpop.xlane.xlu2 %623 }
 0x253   : > { %v636_v29 = vsub.f32 %v568_v1, %v624_v28  ;;  %v1227_v28 = vld [vmem:[%s1756_s4] ss:$0 sm:$0xff] }
 0x255   : > { %v1235_v30 = vpop.eup %1234  ;;  %v649_v32 = vmul.f32 1.442695, %v636_v29 }
 0x256   : > { %v661_v34 = vsel %vm606_vm2, %v1235_v30, 0.0  ;;  %v1237_v37 = vpop.eup %1236 }
 0x257   : > { %1238 = vpow2.f32 %v649_v32  ;;  %662 = vadd.xlane.f32.xlu2 %v661_v34  ;;  %v673_v39 = vsel %vm606_vm2, %v1237_v37, 0.0 }
 0x258   : > { %1240 = vpow2.f32 %v645_v35 }
 0x259   : > { %1242 = vpow2.f32 %v653_v36 }
 0x25d   : > { %v1239_v38 = vpop.eup %1238 }
 0x25e   : > { %v670_v40 = vsel %vm606_vm2, %v1239_v38, 0.0  ;;  %v1241_v42 = vpop.eup %1240 }
 0x25f   : > { %432 = vrot.lane.b32.xlu0 %v1609_v10, %s1452_s16  ;;  %674 = vadd.xlane.f32.xlu2 %v673_v39  ;;  %v1243_v43 = vpop.eup %1242  ;;  %v664_v44 = vsel %vm606_vm2, %v1241_v42, 0.0 }
 0x260   : > { %671 = vadd.xlane.f32.xlu1 %v670_v40  ;;  %v676_v45 = vsel %vm606_vm2, %v1243_v43, 0.0 }
 0x262   : > { %v377_v41 = vpop.permute.xlu1 %376 }
 0x263   : > { %383 = vst.msk [vmem:[#allocation4 + $0x10] sm:$0xff] %vm337_vm1, %v377_v41 }
 0x267   : > { %665 = vadd.xlane.f32.xlu2 %v664_v44 }
 0x268   : > { %677 = vadd.xlane.f32.xlu1 %v676_v45 }
 0x26a   : > { %v459_v46 = vld [vmem:[#allocation4 + $0x10] sm:$0xff] }
 0x26b   : > { %745 = vmatpush.msrb.mxu2 %v459_v46 }
 0x27f   : > { %430 = vrot.lane.b32.xlu2 %v1607_v9, %s1452_s16 }
 0x2b2   : > { %v669_v47 = vpop.xlane.xlu1 %668 }
 0x2b3   : > { %1244 = vrcp.f32 %v669_v47 }
 0x2b6   : > { %v657_v10 = vpop.xlane.xlu0 %656 }
 0x2b7   : > { %1246 = vrcp.f32 %v657_v10 }
 0x2b9   : > { %v1245_v48 = vpop.eup %1244 }
 0x2ba   : > { %v691_v49 = vmul.f32 %v1245_v48, %v1229_v11  ;;  %v811_v11 = vld [vmem:[#allocation10] sm:$0xff] }
 0x2bb   : > { %864 = vmatpush.msra.mxu2 %v811_v11 }
 0x2bc   : > { %1105 = vmatmul.msk.f32.vlgmr.msrb.gmra.mxu3 %vm606_vm2, %v691_v49 }
 0x2bd   : > { %v1247_v50 = vpop.eup %1246 }
 0x2be   : > { %v687_v51 = vmul.f32 %v1247_v50, %v1231_v15  ;;  %v660_v52 = vpop.xlane.xlu0 %659 }
 0x2bf   : > { %1248 = vrcp.f32 %v660_v52 }
 0x2c0   : > { %1101 = vmatmul.msk.f32.vlgmr.msra.gmra.mxu1 %vm606_vm2, %v687_v51 }
 0x2c5   : > { %v1249_v53 = vpop.eup %1248 }
 0x2c6   : > { %v688_v54 = vmul.f32 %v1249_v53, %v1233_v19 }
 0x2c8   : > { %1102 = vmatmul.msk.f32.gmra.mxu1 %vm606_vm2, %v688_v54 }
 0x2ca   : > { %v663_v55 = vpop.xlane.xlu2 %662 }
 0x2cb   : > { %1250 = vrcp.f32 %v663_v55 }
 0x2d1   : > { %v1251_v9 = vpop.eup %1250  ;;  %v433_v56 = vpop.permute.xlu0 %432 }
 0x2d2   : > { %438 = vst.msk [vmem:[#allocation4 + $0x38] sm:$0xff] %vm337_vm1, %v433_v56  ;;  %v675_v57 = vpop.xlane.xlu2 %674  ;;  %v689_v58 = vmul.f32 %v1251_v9, %v1235_v30 }
 0x2d3   : > { %v672_v59 = vpop.xlane.xlu1 %671 }
 0x2d4   : > { %1252 = vrcp.f32 %v672_v59  ;;  %1103 = vmatmul.msk.f32.vlgmr.msrb.gmra.mxu2 %vm606_vm2, %v689_v58 }
 0x2d9   : > { %v464_v60 = vld [vmem:[#allocation4 + $0x38] sm:$0xff] }
 0x2da   : > { %v1253_v61 = vpop.eup %1252  ;;  %802 = vmatpush.msra.mxu0 %v464_v60  ;;  %v666_v62 = vpop.xlane.xlu2 %665 }
 0x2db   : > { %1254 = vrcp.f32 %v666_v62  ;;  %v692_v63 = vmul.f32 %v1253_v61, %v1239_v38  ;;  %v678_v3 = vpop.xlane.xlu1 %677 }
 0x2dc   : > { %1256 = vrcp.f32 %v675_v57 }
 0x2dd   : > { %1106 = vmatmul.msk.f32.gmra.mxu3 %vm606_vm2, %v692_v63  ;;  %1258 = vrcp.f32 %v678_v3 }
 0x2e1   : > { %v1255_v0 = vpop.eup %1254 }
 0x2e2   : > { %v431_v1 = vpop.permute.xlu2 %430  ;;  %v690_v2 = vmul.f32 %v1255_v0, %v1241_v42  ;;  %v1257_v4 = vpop.eup %1256 }
 0x2e3   : > { %437 = vst.msk [vmem:[#allocation4 + $0x30] sm:$0xff] %vm337_vm1, %v431_v1  ;;  %v693_v5 = vmul.f32 %v1257_v4, %v1237_v37  ;;  %v1259_v7 = vpop.eup %1258 }
 0x2e4   : > { %1104 = vmatmul.msk.f32.gmra.mxu2 %vm606_vm2, %v690_v2  ;;  %v694_v8 = vmul.f32 %v1259_v7, %v1243_v43 }
 0x2ea   : > { %v463_v6 = vld [vmem:[#allocation4 + $0x30] sm:$0xff] }
 0x2eb   : > { %803 = vmatpush.msra.mxu0 %v463_v6 }
 0x2ec   : > { %1107 = vmatmul.msk.f32.vlgmr.msra.gmra.mxu0 %vm606_vm2, %v693_v5 }
 0x2ed   : > { %928 = vmatpush.msrb.mxu0 %v906_v16 }
 0x2f4   : > { %1108 = vmatmul.msk.f32.gmra.mxu0 %vm606_vm2, %v694_v8 }
 0x33d   : > { %v718_v14 = vpop.f32.mrf.mxu1 }
 0x33e   : > { %1111 = vmatmul.msk.f32.vlgmr.msra.gmra.mxu2 %vm337_vm1, %v718_v14 }
 0x33f   : > { %v776_v15 = vpop.f32.mrf.mxu3 }
 0x340   : > { %1113 = vmatmul.msk.f32.vlgmr.msra.gmra.mxu3 %vm337_vm1, %v776_v15 }
 0x345   : > { %v721_v17 = vpop.f32.mrf.mxu1 }
 0x346   : > { %1112 = vmatmul.msk.f32.gmra.mxu2 %vm337_vm1, %v721_v17 }
 0x357   : > { %v747_v18 = vpop.f32.mrf.mxu2 }
 0x358   : > { %1109 = vmatmul.msk.f32.vlgmr.msrb.gmra.mxu1 %vm337_vm1, %v747_v18 }
 0x360   : > { %v779_v19 = vpop.f32.mrf.mxu3 }
 0x361   : > { %1114 = vmatmul.msk.f32.gmra.mxu3 %vm337_vm1, %v779_v19 }
 0x367   : > { %v750_v20 = vpop.f32.mrf.mxu2 }
 0x368   : > { %1110 = vmatmul.msk.f32.gmra.mxu1 %vm337_vm1, %v750_v20 }
 0x369   : > { %v805_v21 = vpop.f32.mrf.mxu0 }
 0x36a   : > { %1115 = vmatmul.msk.f32.vlgmr.msrb.gmra.mxu0 %vm337_vm1, %v805_v21 }
 0x371   : > { %v808_v22 = vpop.f32.mrf.mxu0 }
 0x372   : > { %1116 = vmatmul.msk.f32.gmra.mxu0 %vm337_vm1, %v808_v22 }
 0x3c1   : > { %v866_v23 = vpop.f32.mrf.mxu2 }
 0x3c3   : > { %v897_v26 = vpop.f32.mrf.mxu3 }
 0x3c9   : > { %v869_v32 = vpop.f32.mrf.mxu2 }
 0x3d5   : > { %v837_v24 = vpop.f32.mrf.mxu1 }
 0x3d6   : > { %v867_v25 = vadd.f32 %v866_v23, %v837_v24 }
 0x3d8   : > { %v903_v27 = vadd.f32 %v897_v26, %v867_v25 }
 0x3e4   : > { %v900_v35 = vpop.f32.mrf.mxu3 }
 0x3e5   : > { %v840_v29 = vpop.f32.mrf.mxu1 }
 0x3e6   : > { %v870_v33 = vadd.f32 %v869_v32, %v840_v29 }
 0x3e7   : > { %v930_v30 = vpop.f32.mrf.mxu0 }
 0x3e8   : > { %v936_v31 = vadd.f32 %v930_v30, %v903_v27  ;;  %v904_v36 = vadd.f32 %v900_v35, %v870_v33 }
 0x3ea   : > { %v942_v34 = vadd.f32 %v1227_v28, %v936_v31 }
 0x3ec   : > { %944 = vst [vmem:[%s291_s3] sm:$0xff] %v942_v34 }
 0x3ef   : > { %v933_v37 = vpop.f32.mrf.mxu0 }
 0x3f0   : > { %v937_v38 = vadd.f32 %v933_v37, %v904_v36 }
 0x3f2   : > { %v943_v39 = vadd.f32 %v1227_v28, %v937_v38 }
 0x3f4   : > { %945 = vst [vmem:[%s291_s3 + $0x8] sm:$0xff] %v943_v39 }
 0x3f5   : > { %1377 = shalt.err (!%p1374_p0)
}
 0x3f6   : > { %s1453_s25 = smov 128   ;;  %s1454_s8 = smov 8  }
 0x3f7   : > { %1138 = dma.vmem_to_hbm [thread:$0]  (%p1567_p2), %s962_s13, 256, %s964_s14, %s947_s21, %s1453_s25, %s1453_s25, %s1454_s8  }
 0x3f8 PF: > { %s978_s24 = sand.u32 1, %s1416_s18   ;;  %p1152_p4 = pnand %p1074_p10, %p1532_p5 }
 0x3f9   : > { %s979_s1 = scalar_lea.sflag [#allocation7], %s978_s24 }
 0x3fa   : > { %p1153_p6 = pneg %p1152_p4 }
 0x3fc   : > { %1411 = dma.done.wait (%p1153_p6), %s979_s1, 256  }
 0x3fd   : > { %1413 = vsyncadd (%p1153_p6), %s979_s1, 4294967040  ;;  %s22_s23 = sadd.s32 1, %s1436_s23   ;;  %s1771_s18 = smov %s1420_s19 }
 0x3fe   : > { %p19_p8 = scmp.ge.s32.totalorder %s22_s23, 4   ;;  %s1772_s19 = smov %s1424_s20 }
 0x3ff   : > { %s1773_s20 = smov %s1577_s9  ;;  %s1774_s21 = smov %s1432_s22 }
 0x400   : > { %s1775_s22 = smov %s1777_s17  ;;  %21 = sbr.rel (!%p19_p8) target bundleno = 10 (0xa), region = 110 }
 0x405   :  { %985 = vsyncpa [#allocation6], 1 }
 0x406   :  { %987 = vsyncpa [#allocation6 + $0x1], 1 }
 0x407   :  { %988 = vsyncpa [#allocation9], 1 }
 0x408   :  { %989 = vsyncpa [#allocation7], 1 }
 0x409   :  { %991 = vsyncpa [#allocation7 + $0x1], 1 }

// kernel: tpu_custom_call.1
= control target key start
LH: loop header
LB: loop body
LE: loop exit
PB: predicated region body
PF: predicated region fallthrough
CT: control target
= control target key end

     0   :  { %s1752_s0 = inlined_call_operand.hbm [shape: f32[2,16,32], index: 0, kind: input, shape index: {}]   ;;  %s1753_s1 = inlined_call_operand.hbm [shape: f32[32,96], index: 1, kind: input, shape index: {}]   ;;  %s1754_s2 = inlined_call_operand.vmem [shape: f32[1,96], index: 2, kind: input, shape index: {}]   ;;  %s1755_s3 = inlined_call_operand.hbm [shape: f32[4,8,128], index: 3, kind: input, shape index: {}]   ;;  %s1756_s4 = inlined_call_operand.vmem [shape: f32[1,128], index: 4, kind: input, shape index: {}]   ;;  %s1757_s5 = inlined_call_operand.hbm [shape: f32[2,16,128], index: 5, kind: output, shape index: {}]  }
   0x1   :  { %1760 = sst [smem:[#allocation15_spill]] %s1753_s1 }
   0x2   :  { %1761 = sst [smem:[#allocation16_spill]] %s1755_s3 }
   0x3   :  { %10 = vsyncpa [#allocation6], 0 }
   0x4   :  { %12 = vsyncpa [#allocation6 + $0x1], 0 }
   0x5   :  { %13 = vsyncpa [#allocation9], 0 }
   0x6   :  { %14 = vsyncpa [#allocation7], 0 }
   0x7   :  { %16 = vsyncpa [#allocation7 + $0x1], 0  ;;  %s1485_s18 = smov 0   ;;  %s1487_s19 = smov 0  }
   0x8   :  { %s1489_s20 = smov 0   ;;  %s1491_s21 = smov 0  }
   0x9   :  { %s1493_s22 = smov 0   ;;  %s1495_s23 = smov 0  }
   0xa LB: > { %s1069_s24 = sadd.s32 4294967295, %s1436_s23   ;;  %s1070_s25 = sadd.s32 4294967294, %s1436_s23   ;;  %s1436_s23 = sphi %s1495_s23, %s22_s23   ;;  %s1432_s22 = sphi %s1493_s22, %s1775_s22   ;;  %s1428_s21 = sphi %s1491_s21, %s1774_s21   ;;  %s1424_s20 = sphi %s1489_s20, %s1773_s20   ;;  %s1420_s19 = sphi %s1487_s19, %s1772_s19   ;;  %s1416_s18 = sphi %s1485_s18, %s1771_s18  }
   0xb   : > { %p54_p0 = scmp.ne.s32.totalorder %s1420_s19, %s1416_s18  ;;  %p1521_p1 = scmp.eq.s32.totalorder %s1069_s24, 0 }
   0xc   : > { %p170_p2 = scmp.eq.s32.totalorder %s1070_s25, 1  ;;  %p1071_p4 = scmp.ge.s32.totalorder %s1436_s23, 1 }
   0xd   : > { %p1527_p3 = por %p1521_p1, %p54_p0  ;;  %p177_p6 = scmp.lt.s32.totalorder %s1436_s23, 3 }
   0xe   : > { %p1532_p5 = por %p170_p2, %p54_p0  ;;  %s1765_s1 = sld [smem:[#allocation15_spill]] }
   0xf   : > { %p1540_p7 = pnand %p1071_p4, %p177_p6  ;;  %s1438_s8 = smov [#allocation8]  }
  0x10   : > { %s190_s9 = sshll.u32 %s1438_s8, 4  ;;  %p1074_p10 = scmp.ge.s32.totalorder %s1436_s23, 2  ;;  %s191_s9 = int_to_ptr.vmem [resolvable:$true] %s190_s9 }
  0x11   : > { %p1140_p8 = pneg %p1540_p7  ;;  %s1767_s3 = sld [smem:[#allocation16_spill]] }
  0x12   : > { %s1758_s13 = smov 128   ;;  %s1759_s14 = smov 8  }
  0x13   : > { %p1141_p9 = pnand %p1140_p8, %p1521_p1  ;;  %s1441_s15 = smov [#allocation10]  }
  0x14   : > { %s188_s6 = sshll.u32 %s1765_s1, 4  ;;  %s207_s16 = sshll.u32 %s1441_s15, 4  ;;  %s189_s6 = int_to_ptr.hbm [resolvable:$true] %s188_s6  ;;  %s208_s16 = int_to_ptr.vmem [resolvable:$true] %s207_s16 }
  0x15   : > { %1143 = dma.hbm_to_vmem [thread:$0]  (!%p1141_p9), %s189_s6, 512, %s191_s9, [#allocation9], %s1758_s13, %s1758_s13, %s1759_s14  }
  0x16   : > { %p164_p11 = scmp.eq.s32.totalorder %s1069_s24, 1  ;;  %s34_s17 = sadd.s32 1, %s1432_s22 }
  0x17   : > { %s205_s12 = sshll.u32 %s1767_s3, 4  ;;  %p36_p12 = scmp.ge.s32.totalorder %s34_s17, 2  ;;  %s206_s12 = int_to_ptr.hbm [resolvable:$true] %s205_s12 }
  0x18   : > { %1146 = dma.hbm_to_vmem [thread:$0]  (!%p1141_p9), %s206_s12, 512, %s208_s16, [#allocation9], %s1758_s13, %s1758_s13, %s1759_s14  }
  0x19   : > { %s41_s25 = sadd.s32 1, %s1424_s20  ;;  %p48_p13 = scmp.ne.s32.totalorder %s1424_s20, %s1420_s19 }
  0x1a   : > { %p49_p0 = scmp.eq.s32.totalorder %s1436_s23, 0  ;;  %s1777_s17 = smov (%p36_p12, %s34_s17), 0 }
  0x1b   : > { %p1567_p2 = por %p164_p11, %p48_p13  ;;  %p1157_p4 = scmp.lt.s32.totalorder %s1436_s23, 2 }
  0x1c   : > { %s38_s30 = ssub.s32 %s1432_s22, %s1777_s17  ;;  %s224_s6 = sand.u32 1, %s1424_s20  }
  0x1d   : > { %p39_p6 = scmp.eq.s32.totalorder %s38_s30, 0  ;;  %p50_p8 = por %p49_p0, %p48_p13 }
  0x1e   : > { %s1075_s8 = sshll.u32 %s224_s6, 4  ;;  %s1122_s24 = sshll.u32 %s1432_s22, 4 }
  0x1f   : > { %s1577_s9 = scalar_select %p39_p6, %s1424_s20, %s41_s25  }
  0x20   : > { %s233_s12 = scalar_lea.hbm %s1752_s0, %s1122_s24  ;;  %s228_s16 = scalar_lea.vmem [#allocation5], %s1075_s8 }
  0x21   : > { %s234_s15 = sshll.u32 %s233_s12, 4  ;;  %s236_s13 = sshll.u32 %s228_s16, 4  ;;  %s235_s15 = int_to_ptr.hbm [resolvable:$true] %s234_s15  ;;  %s237_s13 = int_to_ptr.vmem [resolvable:$true] %s236_s13 }
  0x22   : > { %p1148_p9 = pnand %p1157_p4, %p50_p8  ;;  %s225_s14 = scalar_lea.sflag [#allocation6], %s224_s6 }
  0x23   : > { %s1769_s1 = smov 8   ;;  %s1770_s3 = smov 128  }
  0x24   : > { %1150 = dma.hbm_to_vmem [thread:$0]  (!%p1148_p9), %s235_s15, 256, %s237_s13, %s225_s14, %s1770_s3, %s1770_s3, %s1769_s1  }
  0x25   : > { %248 = sbr.rel (%p1540_p7) target bundleno = 1016 (0x3f8), region = 40  ;;  %s1590_s25 = sand.u32 (!%p1540_p7), 1, %s1420_s19  }
  0x26   : > { %s1079_s30 = sshll.u32 (!%p1540_p7), %s1590_s25, 4  ;;  %s251_s8 = scalar_lea.sflag (!%p1540_p7), [#allocation6], %s1590_s25 }
  0x27   : > { %s254_s24 = scalar_lea.vmem (!%p1540_p7), [#allocation5], %s1079_s30 }
  0x2a   : > { %1403 = dma.done.wait (%p1527_p3), %s251_s8, 256  }
  0x2b   : > { %1405 = vsyncadd (%p1527_p3), %s251_s8, 4294967040 }
  0x2c   : > { %1407 = dma.done.wait (%p1521_p1), [#allocation9], 1024  }
  0x2d   : > { %1409 = vsyncadd (%p1521_p1), [#allocation9], 4294966272  ;;  %v302_v0 = vld [vmem:[#allocation8 + $0x18] sm:$0xff]  ;;  %v301_v1 = vld [vmem:[#allocation8 + $0x10] sm:$0xff]  ;;  %vm307_vm0 = vcmask 261120   ;;  %vm337_vm1 = vcmask 64512  }
  0x2e   : > { %326 = vmatpush.msra.mxu0 %v302_v0  ;;  %1124 = vmatpush.msra.mxu1 %v302_v0  ;;  %v300_v2 = vld [vmem:[#allocation8 + $0x8] sm:$0xff]  ;;  %v299_v3 = vld [vmem:[#allocation8] sm:$0xff]  ;;  %s1442_s26 = smov 80   ;;  %s1443_s27 = smov 88   ;;  %vm606_vm2 = vcmask 130048  }
  0x2f   : > { %v297_v4 = vld [vmem:[%s254_s24] sm:$0xff]  ;;  %v298_v5 = vld [vmem:[%s254_s24 + $0x8] sm:$0xff]  ;;  %s1444_s7 = smov 96   ;;  %s1445_s13 = smov 112  }
  0x30   : > { %327 = vmatpush.msra.mxu0 %v301_v1  ;;  %1125 = vmatpush.msra.mxu1 %v301_v1  ;;  %v1226_v6 = vld [vmem:[%s1754_s2] ss:$0 sm:$0xff]  ;;  %s1446_s14 = smov 120   ;;  %s1447_s6 = smov 72  }
  0x31   : > { %s1448_s10 = smov 104   ;;  %s1449_s11 = smov 48  }
  0x32   : > { %328 = vmatpush.msra.mxu0 %v300_v2  ;;  %1126 = vmatpush.msra.mxu1 %v300_v2  ;;  %s1450_s12 = smov 64   ;;  %s1451_s15 = smov 56  }
  0x33   : > { %s1452_s16 = smov 40   ;;  %s1123_s1 = sshll.u32 %s1428_s21, 4 }
  0x34   : > { %329 = vmatpush.msra.mxu0 %v299_v3  ;;  %1127 = vmatpush.msra.mxu1 %v299_v3  ;;  %s291_s3 = scalar_lea.vmem [#allocation11], %s1079_s30  ;;  %s947_s21 = scalar_lea.sflag [#allocation7], %s1590_s25 }
  0x35   : > { %1083 = vmatmul.msk.f32.vlgmr.msra.gmra.mxu0 %vm307_vm0, %v297_v4  ;;  %1084 = vmatmul.msk.f32.vlgmr.msra.gmra.mxu1 %vm307_vm0, %v298_v5 }
  0xb2   : > { %v331_v7 = vpop.f32.mrf.mxu0  ;;  %v334_v8 = vpop.f32.mrf.mxu1 }
  0xb3   : > { %v1607_v9 = vadd.f32 %v1226_v6, %v331_v7  ;;  %v1609_v10 = vadd.f32 %v1226_v6, %v334_v8 }
  0xb5   : > { %396 = vrot.lane.b32.xlu0 %v1609_v10, %s1442_s26  ;;  %367 = vrot.lane.b32.xlu2 %v1607_v9, %s1443_s27  ;;  %338 = vst.msk [vmem:[#allocation2] sm:$0xff] %vm337_vm1, %v1607_v9 }
  0xb6   : > { %394 = vrot.lane.b32.xlu1 %v1607_v9, %s1442_s26  ;;  %339 = vst.msk [vmem:[#allocation2 + $0x8] sm:$0xff] %vm337_vm1, %v1609_v10 }
  0xbc   : > { %v441_v33 = vld [vmem:[#allocation2] sm:$0xff] }
  0xbd   : > { %369 = vrot.lane.b32.xlu0 %v1609_v10, %s1443_s27  ;;  %344 = vrot.lane.b32.xlu2 %v1609_v10, %s1444_s7  ;;  %v442_v38 = vld [vmem:[#allocation2 + $0x8] sm:$0xff] }
  0xbe   : > { %385 = vrot.lane.b32.xlu1 %v1607_v9, %s1445_s13 }
  0xc5   : > { %358 = vrot.lane.b32.xlu0 %v1607_v9, %s1446_s14  ;;  %387 = vrot.lane.b32.xlu2 %v1609_v10, %s1445_s13  ;;  %s961_s13 = sshll.u32 %s291_s3, 4  ;;  %s962_s13 = int_to_ptr.vmem [resolvable:$true] %s961_s13 }
  0xc6   : > { %342 = vrot.lane.b32.xlu1 %v1607_v9, %s1444_s7  ;;  %s960_s7 = scalar_lea.hbm %s1757_s5, %s1123_s1 }
  0xcd   : > { %360 = vrot.lane.b32.xlu0 %v1609_v10, %s1446_s14  ;;  %421 = vrot.lane.b32.xlu2 %v1607_v9, %s1447_s6  ;;  %s963_s14 = sshll.u32 %s960_s7, 4  ;;  %s964_s14 = int_to_ptr.hbm [resolvable:$true] %s963_s14 }
  0xce   : > { %423 = vrot.lane.b32.xlu1 %v1609_v10, %s1447_s6  ;;  %s1364_s6 = sshra.s32 %s964_s14, 4  ;;  %s1365_s6 = int_to_ptr.hbm [resolvable:$true] %s1364_s6 }
  0xcf   : > { %s1366_s30 = scalar_lea.hbm %s1365_s6, 16  ;;  %p1371_p11 = scmp.lt.s32.totalorder %s1365_s6, %s1757_s5 }
  0xd0   : > { %p1367_p1 = scmp.ne.s32.totalorder %s1365_s6, %s1366_s30 }
  0xd2   : > { %p1368_p3 = pnand %p1367_p1, %p1567_p2 }
  0xd4   : > { %p1369_p7 = pneg %p1368_p3 }
  0xd5   : > { %412 = vrot.lane.b32.xlu0 %v1607_v9, %s1448_s10  ;;  %403 = vrot.lane.b32.xlu2 %v1607_v9, %s1449_s11 }
  0xd6   : > { %414 = vrot.lane.b32.xlu1 %v1609_v10, %s1448_s10 }
  0xdd   : > { %405 = vrot.lane.b32.xlu0 %v1609_v10, %s1449_s11 }
  0xde   : > { %352 = vrot.lane.b32.xlu1 %v1609_v10, %s1450_s12 }
  0xe5   : > { %378 = vrot.lane.b32.xlu0 %v1609_v10, %s1451_s15 }
  0xe6   : > { %350 = vrot.lane.b32.xlu1 %v1607_v9, %s1450_s12  ;;  %s1370_s12 = scalar_lea.hbm %s1757_s5, 32 }
  0xe7   : > { %p1372_p12 = scmp.lt.s32.totalorder %s1370_s12, %s1366_s30 }
  0xe9   : > { %p1373_p13 = por %p1372_p12, %p1371_p11 }
  0xeb   : > { %p1374_p0 = pnand %p1373_p13, %p1369_p7 }
 0x10f   : > { %v368_v11 = vpop.permute.xlu2 %367 }
 0x110   : > { %374 = vst.msk [vmem:[#allocation3 + $0x10] sm:$0xff] %vm337_vm1, %v368_v11 }
 0x117   : > { %v345_v12 = vpop.permute.xlu2 %344  ;;  %v451_v27 = vld [vmem:[#allocation3 + $0x10] sm:$0xff] }
 0x118   : > { %349 = vst.msk [vmem:[#allocation3 + $0x8] sm:$0xff] %vm337_vm1, %v345_v12 }
 0x11f   : > { %v388_v13 = vpop.permute.xlu2 %387  ;;  %v450_v14 = vld [vmem:[#allocation3 + $0x8] sm:$0xff] }
 0x120   : > { %393 = vst.msk [vmem:[#allocation2 + $0x28] sm:$0xff] %vm337_vm1, %v388_v13  ;;  %1085 = vmatpush.xpose.msk.msrb.mxu1 %vm337_vm1, %v450_v14 }
 0x127   : > { %v397_v15 = vpop.permute.xlu0 %396  ;;  %v422_v16 = vpop.permute.xlu2 %421  ;;  %v446_v32 = vld [vmem:[#allocation2 + $0x28] sm:$0xff] }
 0x128   : > { %402 = vst.msk [vmem:[#allocation3 + $0x28] sm:$0xff] %vm337_vm1, %v397_v15  ;;  %v395_v17 = vpop.permute.xlu1 %394 }
 0x129   : > { %428 = vst.msk [vmem:[#allocation3 + $0x30] sm:$0xff] %vm337_vm1, %v422_v16 }
 0x12a   : > { %401 = vst.msk [vmem:[#allocation3 + $0x20] sm:$0xff] %vm337_vm1, %v395_v17 }
 0x12f   : > { %v370_v18 = vpop.permute.xlu0 %369  ;;  %v404_v19 = vpop.permute.xlu2 %403  ;;  %v454_v20 = vld [vmem:[#allocation3 + $0x28] sm:$0xff] }
 0x130   : > { %375 = vst.msk [vmem:[#allocation3 + $0x18] sm:$0xff] %vm337_vm1, %v370_v18  ;;  %v386_v21 = vpop.permute.xlu1 %385  ;;  %1093 = vmatpush.xpose.msk.msra.mxu3 %vm337_vm1, %v454_v20  ;;  %v455_v39 = vld [vmem:[#allocation3 + $0x30] sm:$0xff] }
 0x131   : > { %410 = vst.msk [vmem:[#allocation4 + $0x20] sm:$0xff] %vm337_vm1, %v404_v19  ;;  %v453_v22 = vld [vmem:[#allocation3 + $0x20] sm:$0xff] }
 0x132   : > { %392 = vst.msk [vmem:[#allocation2 + $0x20] sm:$0xff] %vm337_vm1, %v386_v21 }
 0x134   : > { %1094 = vmatpush.xpose.msk.msra.mxu3 %vm337_vm1, %v453_v22 }
 0x137   : > { %v359_v23 = vpop.permute.xlu0 %358  ;;  %v452_v24 = vld [vmem:[#allocation3 + $0x18] sm:$0xff] }
 0x138   : > { %365 = vst.msk [vmem:[#allocation2 + $0x10] sm:$0xff] %vm337_vm1, %v359_v23  ;;  %v343_v25 = vpop.permute.xlu1 %342  ;;  %1089 = vmatpush.xpose.msk.msra.mxu2 %vm337_vm1, %v452_v24  ;;  %v461_v48 = vld [vmem:[#allocation4 + $0x20] sm:$0xff] }
 0x139   : > { %348 = vst.msk [vmem:[#allocation3] sm:$0xff] %vm337_vm1, %v343_v25  ;;  %v445_v26 = vld [vmem:[#allocation2 + $0x20] sm:$0xff] }
 0x13a   : > { %1095 = vmatmul.msk.f32.vlgmr.msra.gmra.mxu3 %vm337_vm1, %v445_v26 }
 0x13c   : > { %1090 = vmatpush.xpose.msk.msra.mxu2 %vm337_vm1, %v451_v27 }
 0x13f   : > { %v361_v28 = vpop.permute.xlu0 %360  ;;  %v443_v29 = vld [vmem:[#allocation2 + $0x10] sm:$0xff] }
 0x140   : > { %366 = vst.msk [vmem:[#allocation2 + $0x18] sm:$0xff] %vm337_vm1, %v361_v28  ;;  %v424_v30 = vpop.permute.xlu1 %423  ;;  %v449_v31 = vld [vmem:[#allocation3] sm:$0xff]  ;;  %1091 = vmatmul.msk.f32.vlgmr.msra.gmra.mxu2 %vm337_vm1, %v443_v29 }
 0x141   : > { %429 = vst.msk [vmem:[#allocation3 + $0x38] sm:$0xff] %vm337_vm1, %v424_v30  ;;  %1086 = vmatpush.xpose.msk.msrb.mxu1 %vm337_vm1, %v449_v31 }
 0x142   : > { %1096 = vmatmul.msk.f32.gmra.mxu3 %vm337_vm1, %v446_v32 }
 0x144   : > { %1087 = vmatmul.msk.f32.vlgmr.msrb.gmra.mxu1 %vm337_vm1, %v441_v33 }
 0x147   : > { %v413_v34 = vpop.permute.xlu0 %412  ;;  %v444_v35 = vld [vmem:[#allocation2 + $0x18] sm:$0xff] }
 0x148   : > { %419 = vst.msk [vmem:[#allocation2 + $0x30] sm:$0xff] %vm337_vm1, %v413_v34  ;;  %v415_v36 = vpop.permute.xlu1 %414  ;;  %1092 = vmatmul.msk.f32.gmra.mxu2 %vm337_vm1, %v444_v35  ;;  %v456_v37 = vld [vmem:[#allocation3 + $0x38] sm:$0xff] }
 0x149   : > { %420 = vst.msk [vmem:[#allocation2 + $0x38] sm:$0xff] %vm337_vm1, %v415_v36  ;;  %1097 = vmatpush.xpose.msk.msrb.mxu0 %vm337_vm1, %v456_v37 }
 0x14c   : > { %1088 = vmatmul.msk.f32.gmra.mxu1 %vm337_vm1, %v442_v38 }
 0x14d   : > { %1098 = vmatpush.xpose.msk.msrb.mxu0 %vm337_vm1, %v455_v39 }
 0x14f   : > { %v406_v40 = vpop.permute.xlu0 %405  ;;  %v447_v41 = vld [vmem:[#allocation2 + $0x30] sm:$0xff] }
 0x150   : > { %411 = vst.msk [vmem:[#allocation4 + $0x28] sm:$0xff] %vm337_vm1, %v406_v40  ;;  %v353_v42 = vpop.permute.xlu1 %352  ;;  %1099 = vmatmul.msk.f32.vlgmr.msrb.gmra.mxu0 %vm337_vm1, %v447_v41  ;;  %v448_v44 = vld [vmem:[#allocation2 + $0x38] sm:$0xff] }
 0x151   : > { %357 = vst.msk [vmem:[#allocation4 + $0x8] sm:$0xff] %vm337_vm1, %v353_v42 }
 0x157   : > { %v379_v43 = vpop.permute.xlu0 %378  ;;  %v462_v45 = vld [vmem:[#allocation4 + $0x28] sm:$0xff] }
 0x158   : > { %384 = vst.msk [vmem:[#allocation4 + $0x18] sm:$0xff] %vm337_vm1, %v379_v43  ;;  %v351_v46 = vpop.permute.xlu1 %350  ;;  %1100 = vmatmul.msk.f32.gmra.mxu0 %vm337_vm1, %v448_v44  ;;  %v458_v47 = vld [vmem:[#allocation4 + $0x8] sm:$0xff]  ;;  %773 = vmatpush.msrb.mxu3 %v462_v45 }
 0x159   : > { %356 = vst.msk [vmem:[#allocation4] sm:$0xff] %vm337_vm1, %v351_v46  ;;  %715 = vmatpush.msra.mxu1 %v458_v47 }
 0x15a   : > { %774 = vmatpush.msrb.mxu3 %v461_v48 }
 0x15f   : > { %v460_v49 = vld [vmem:[#allocation4 + $0x18] sm:$0xff] }
 0x160   : > { %v457_v50 = vld [vmem:[#allocation4] sm:$0xff]  ;;  %744 = vmatpush.msrb.mxu2 %v460_v49 }
 0x161   : > { %716 = vmatpush.msra.mxu1 %v457_v50 }
 0x1bd   : > { %v565_v51 = vpop.f32.mrf.mxu3 }
 0x1be   : > { %v619_v52 = vsel %vm606_vm2, %v565_v51, -inf }
 0x1bf   : > { %620 = vmax.xlane.f32.xlu2 %v619_v52 }
 0x1c1   : > { %v495_v53 = vpop.f32.mrf.mxu1 }
 0x1c2   : > { %v607_v54 = vsel %vm606_vm2, %v495_v53, -inf }
 0x1c3   : > { %608 = vmax.xlane.f32.xlu0 %v607_v54  ;;  %v530_v55 = vpop.f32.mrf.mxu2 }
 0x1c4   : > { %v613_v63 = vsel %vm606_vm2, %v530_v55, -inf }
 0x1c5   : > { %v568_v1 = vpop.f32.mrf.mxu3 }
 0x1c6   : > { %v622_v2 = vsel %vm606_vm2, %v568_v1, -inf }
 0x1c9   : > { %v498_v56 = vpop.f32.mrf.mxu1 }
 0x1ca   : > { %v610_v57 = vsel %vm606_vm2, %v498_v56, -inf }
 0x1cb   : > { %611 = vmax.xlane.f32.xlu2 %v610_v57  ;;  %v533_v58 = vpop.f32.mrf.mxu2 }
 0x1cc   : > { %v616_v59 = vsel %vm606_vm2, %v533_v58, -inf }
 0x1cd   : > { %v600_v60 = vpop.f32.mrf.mxu0  ;;  %617 = vmax.xlane.f32.xlu0 %v616_v59 }
 0x1ce   : > { %v625_v61 = vsel %vm606_vm2, %v600_v60, -inf }
 0x1cf   : > { %626 = vmax.xlane.f32.xlu1 %v625_v61 }
 0x1d5   : > { %v603_v62 = vpop.f32.mrf.mxu0 }
 0x1d6   : > { %v628_v0 = vsel %vm606_vm2, %v603_v62, -inf }
 0x1d7   : > { %614 = vmax.xlane.f32.xlu1 %v613_v63  ;;  %629 = vmax.xlane.f32.xlu2 %v628_v0 }
 0x1df   : > { %623 = vmax.xlane.f32.xlu2 %v622_v2 }
 0x1f0   : > { %376 = vrot.lane.b32.xlu1 %v1607_v9, %s1451_s15 }
 0x232   : > { %v621_v3 = vpop.xlane.xlu2 %620 }
 0x233   : > { %v635_v4 = vsub.f32 %v565_v51, %v621_v3 }
 0x235   : > { %v647_v5 = vmul.f32 1.442695, %v635_v4 }
 0x236   : > { %v609_v6 = vpop.xlane.xlu0 %608 }
 0x237   : > { %1228 = vpow2.f32 %v647_v5  ;;  %v631_v7 = vsub.f32 %v495_v53, %v609_v6 }
 0x239   : > { %v639_v8 = vmul.f32 1.442695, %v631_v7 }
 0x23b   : > { %1230 = vpow2.f32 %v639_v8 }
 0x23d   : > { %v1229_v11 = vpop.eup %1228 }
 0x23e   : > { %v667_v12 = vsel %vm606_vm2, %v1229_v11, 0.0  ;;  %v612_v13 = vpop.xlane.xlu2 %611 }
 0x23f   : > { %668 = vadd.xlane.f32.xlu1 %v667_v12  ;;  %v632_v14 = vsub.f32 %v498_v56, %v612_v13  ;;  %v873_v12 = vld [vmem:[#allocation10 + $0x10] sm:$0xff]  ;;  %v813_v13 = vld [vmem:[#allocation10 + $0x8] sm:$0xff] }
 0x240   : > { %v618_v27 = vpop.xlane.xlu0 %617  ;;  %895 = vmatpush.msra.mxu3 %v873_v12  ;;  %835 = vmatpush.msrb.mxu1 %v813_v13 }
 0x241   : > { %v1231_v15 = vpop.eup %1230  ;;  %v641_v16 = vmul.f32 1.442695, %v632_v14  ;;  %v634_v31 = vsub.f32 %v533_v58, %v618_v27 }
 0x242   : > { %v627_v17 = vpop.xlane.xlu1 %626  ;;  %v655_v18 = vsel %vm606_vm2, %v1231_v15, 0.0 }
 0x243   : > { %1232 = vpow2.f32 %v641_v16  ;;  %656 = vadd.xlane.f32.xlu0 %v655_v18  ;;  %v637_v24 = vsub.f32 %v600_v60, %v627_v17  ;;  %v645_v35 = vmul.f32 1.442695, %v634_v31  ;;  %v906_v16 = vld [vmem:[#allocation10 + $0x18] sm:$0xff] }
 0x245   : > { %v651_v26 = vmul.f32 1.442695, %v637_v24 }
 0x249   : > { %v1233_v19 = vpop.eup %1232 }
 0x24a   : > { %v615_v20 = vpop.xlane.xlu1 %614  ;;  %v658_v21 = vsel %vm606_vm2, %v1233_v19, 0.0  ;;  %v630_v22 = vpop.xlane.xlu2 %629 }
 0x24b   : > { %v633_v23 = vsub.f32 %v530_v55, %v615_v20  ;;  %659 = vadd.xlane.f32.xlu0 %v658_v21  ;;  %v638_v33 = vsub.f32 %v603_v62, %v630_v22 }
 0x24d   : > { %v643_v25 = vmul.f32 1.442695, %v633_v23  ;;  %v653_v36 = vmul.f32 1.442695, %v638_v33 }
 0x24f   : > { %1234 = vpow2.f32 %v643_v25 }
 0x250   : > { %1236 = vpow2.f32 %v651_v26 }
 0x252   : > { %v624_v28 = vpop.xlane.xlu2 %623 }
 0x253   : > { %v636_v29 = vsub.f32 %v568_v1, %v624_v28  ;;  %v1227_v28 = vld [vmem:[%s1756_s4] ss:$0 sm:$0xff] }
 0x255   : > { %v1235_v30 = vpop.eup %1234  ;;  %v649_v32 = vmul.f32 1.442695, %v636_v29 }
 0x256   : > { %v661_v34 = vsel %vm606_vm2, %v1235_v30, 0.0  ;;  %v1237_v37 = vpop.eup %1236 }
 0x257   : > { %1238 = vpow2.f32 %v649_v32  ;;  %662 = vadd.xlane.f32.xlu2 %v661_v34  ;;  %v673_v39 = vsel %vm606_vm2, %v1237_v37, 0.0 }
 0x258   : > { %1240 = vpow2.f32 %v645_v35 }
 0x259   : > { %1242 = vpow2.f32 %v653_v36 }
 0x25d   : > { %v1239_v38 = vpop.eup %1238 }
 0x25e   : > { %v670_v40 = vsel %vm606_vm2, %v1239_v38, 0.0  ;;  %v1241_v42 = vpop.eup %1240 }
 0x25f   : > { %432 = vrot.lane.b32.xlu0 %v1609_v10, %s1452_s16  ;;  %674 = vadd.xlane.f32.xlu2 %v673_v39  ;;  %v1243_v43 = vpop.eup %1242  ;;  %v664_v44 = vsel %vm606_vm2, %v1241_v42, 0.0 }
 0x260   : > { %671 = vadd.xlane.f32.xlu1 %v670_v40  ;;  %v676_v45 = vsel %vm606_vm2, %v1243_v43, 0.0 }
 0x262   : > { %v377_v41 = vpop.permute.xlu1 %376 }
 0x263   : > { %383 = vst.msk [vmem:[#allocation4 + $0x10] sm:$0xff] %vm337_vm1, %v377_v41 }
 0x267   : > { %665 = vadd.xlane.f32.xlu2 %v664_v44 }
 0x268   : > { %677 = vadd.xlane.f32.xlu1 %v676_v45 }
 0x26a   : > { %v459_v46 = vld [vmem:[#allocation4 + $0x10] sm:$0xff] }
 0x26b   : > { %745 = vmatpush.msrb.mxu2 %v459_v46 }
 0x27f   : > { %430 = vrot.lane.b32.xlu2 %v1607_v9, %s1452_s16 }
 0x2b2   : > { %v669_v47 = vpop.xlane.xlu1 %668 }
 0x2b3   : > { %1244 = vrcp.f32 %v669_v47 }
 0x2b6   : > { %v657_v10 = vpop.xlane.xlu0 %656 }
 0x2b7   : > { %1246 = vrcp.f32 %v657_v10 }
 0x2b9   : > { %v1245_v48 = vpop.eup %1244 }
 0x2ba   : > { %v691_v49 = vmul.f32 %v1245_v48, %v1229_v11  ;;  %v811_v11 = vld [vmem:[#allocation10] sm:$0xff] }
 0x2bb   : > { %864 = vmatpush.msra.mxu2 %v811_v11 }
 0x2bc   : > { %1105 = vmatmul.msk.f32.vlgmr.msrb.gmra.mxu3 %vm606_vm2, %v691_v49 }
 0x2bd   : > { %v1247_v50 = vpop.eup %1246 }
 0x2be   : > { %v687_v51 = vmul.f32 %v1247_v50, %v1231_v15  ;;  %v660_v52 = vpop.xlane.xlu0 %659 }
 0x2bf   : > { %1248 = vrcp.f32 %v660_v52 }
 0x2c0   : > { %1101 = vmatmul.msk.f32.vlgmr.msra.gmra.mxu1 %vm606_vm2, %v687_v51 }
 0x2c5   : > { %v1249_v53 = vpop.eup %1248 }
 0x2c6   : > { %v688_v54 = vmul.f32 %v1249_v53, %v1233_v19 }
 0x2c8   : > { %1102 = vmatmul.msk.f32.gmra.mxu1 %vm606_vm2, %v688_v54 }
 0x2ca   : > { %v663_v55 = vpop.xlane.xlu2 %662 }
 0x2cb   : > { %1250 = vrcp.f32 %v663_v55 }
 0x2d1   : > { %v1251_v9 = vpop.eup %1250  ;;  %v433_v56 = vpop.permute.xlu0 %432 }
 0x2d2   : > { %438 = vst.msk [vmem:[#allocation4 + $0x38] sm:$0xff] %vm337_vm1, %v433_v56  ;;  %v675_v57 = vpop.xlane.xlu2 %674  ;;  %v689_v58 = vmul.f32 %v1251_v9, %v1235_v30 }
 0x2d3   : > { %v672_v59 = vpop.xlane.xlu1 %671 }
 0x2d4   : > { %1252 = vrcp.f32 %v672_v59  ;;  %1103 = vmatmul.msk.f32.vlgmr.msrb.gmra.mxu2 %vm606_vm2, %v689_v58 }
 0x2d9   : > { %v464_v60 = vld [vmem:[#allocation4 + $0x38] sm:$0xff] }
 0x2da   : > { %v1253_v61 = vpop.eup %1252  ;;  %802 = vmatpush.msra.mxu0 %v464_v60  ;;  %v666_v62 = vpop.xlane.xlu2 %665 }
 0x2db   : > { %1254 = vrcp.f32 %v666_v62  ;;  %v692_v63 = vmul.f32 %v1253_v61, %v1239_v38  ;;  %v678_v3 = vpop.xlane.xlu1 %677 }
 0x2dc   : > { %1256 = vrcp.f32 %v675_v57 }
 0x2dd   : > { %1106 = vmatmul.msk.f32.gmra.mxu3 %vm606_vm2, %v692_v63  ;;  %1258 = vrcp.f32 %v678_v3 }
 0x2e1   : > { %v1255_v0 = vpop.eup %1254 }
 0x2e2   : > { %v431_v1 = vpop.permute.xlu2 %430  ;;  %v690_v2 = vmul.f32 %v1255_v0, %v1241_v42  ;;  %v1257_v4 = vpop.eup %1256 }
 0x2e3   : > { %437 = vst.msk [vmem:[#allocation4 + $0x30] sm:$0xff] %vm337_vm1, %v431_v1  ;;  %v693_v5 = vmul.f32 %v1257_v4, %v1237_v37  ;;  %v1259_v7 = vpop.eup %1258 }
 0x2e4   : > { %1104 = vmatmul.msk.f32.gmra.mxu2 %vm606_vm2, %v690_v2  ;;  %v694_v8 = vmul.f32 %v1259_v7, %v1243_v43 }
 0x2ea   : > { %v463_v6 = vld [vmem:[#allocation4 + $0x30] sm:$0xff] }
 0x2eb   : > { %803 = vmatpush.msra.mxu0 %v463_v6 }
 0x2ec   : > { %1107 = vmatmul.msk.f32.vlgmr.msra.gmra.mxu0 %vm606_vm2, %v693_v5 }
 0x2ed   : > { %928 = vmatpush.msrb.mxu0 %v906_v16 }
 0x2f4   : > { %1108 = vmatmul.msk.f32.gmra.mxu0 %vm606_vm2, %v694_v8 }
 0x33d   : > { %v718_v14 = vpop.f32.mrf.mxu1 }
 0x33e   : > { %1111 = vmatmul.msk.f32.vlgmr.msra.gmra.mxu2 %vm337_vm1, %v718_v14 }
 0x33f   : > { %v776_v15 = vpop.f32.mrf.mxu3 }
 0x340   : > { %1113 = vmatmul.msk.f32.vlgmr.msra.gmra.mxu3 %vm337_vm1, %v776_v15 }
 0x345   : > { %v721_v17 = vpop.f32.mrf.mxu1 }
 0x346   : > { %1112 = vmatmul.msk.f32.gmra.mxu2 %vm337_vm1, %v721_v17 }
 0x357   : > { %v747_v18 = vpop.f32.mrf.mxu2 }
 0x358   : > { %1109 = vmatmul.msk.f32.vlgmr.msrb.gmra.mxu1 %vm337_vm1, %v747_v18 }
 0x360   : > { %v779_v19 = vpop.f32.mrf.mxu3 }
 0x361   : > { %1114 = vmatmul.msk.f32.gmra.mxu3 %vm337_vm1, %v779_v19 }
 0x367   : > { %v750_v20 = vpop.f32.mrf.mxu2 }
 0x368   : > { %1110 = vmatmul.msk.f32.gmra.mxu1 %vm337_vm1, %v750_v20 }
 0x369   : > { %v805_v21 = vpop.f32.mrf.mxu0 }
 0x36a   : > { %1115 = vmatmul.msk.f32.vlgmr.msrb.gmra.mxu0 %vm337_vm1, %v805_v21 }
 0x371   : > { %v808_v22 = vpop.f32.mrf.mxu0 }
 0x372   : > { %1116 = vmatmul.msk.f32.gmra.mxu0 %vm337_vm1, %v808_v22 }
 0x3c1   : > { %v866_v23 = vpop.f32.mrf.mxu2 }
 0x3c3   : > { %v897_v26 = vpop.f32.mrf.mxu3 }
 0x3c9   : > { %v869_v32 = vpop.f32.mrf.mxu2 }
 0x3d5   : > { %v837_v24 = vpop.f32.mrf.mxu1 }
 0x3d6   : > { %v867_v25 = vadd.f32 %v866_v23, %v837_v24 }
 0x3d8   : > { %v903_v27 = vadd.f32 %v897_v26, %v867_v25 }
 0x3e4   : > { %v900_v35 = vpop.f32.mrf.mxu3 }
 0x3e5   : > { %v840_v29 = vpop.f32.mrf.mxu1 }
 0x3e6   : > { %v870_v33 = vadd.f32 %v869_v32, %v840_v29 }
 0x3e7   : > { %v930_v30 = vpop.f32.mrf.mxu0 }
 0x3e8   : > { %v936_v31 = vadd.f32 %v930_v30, %v903_v27  ;;  %v904_v36 = vadd.f32 %v900_v35, %v870_v33 }
 0x3ea   : > { %v942_v34 = vadd.f32 %v1227_v28, %v936_v31 }
 0x3ec   : > { %944 = vst [vmem:[%s291_s3] sm:$0xff] %v942_v34 }
 0x3ef   : > { %v933_v37 = vpop.f32.mrf.mxu0 }
 0x3f0   : > { %v937_v38 = vadd.f32 %v933_v37, %v904_v36 }
 0x3f2   : > { %v943_v39 = vadd.f32 %v1227_v28, %v937_v38 }
 0x3f4   : > { %945 = vst [vmem:[%s291_s3 + $0x8] sm:$0xff] %v943_v39 }
 0x3f5   : > { %1377 = shalt.err (!%p1374_p0)
}
 0x3f6   : > { %s1453_s25 = smov 128   ;;  %s1454_s8 = smov 8  }
 0x3f7   : > { %1138 = dma.vmem_to_hbm [thread:$0]  (%p1567_p2), %s962_s13, 256, %s964_s14, %s947_s21, %s1453_s25, %s1453_s25, %s1454_s8  }
 0x3f8 PF: > { %s978_s24 = sand.u32 1, %s1416_s18   ;;  %p1152_p4 = pnand %p1074_p10, %p1532_p5 }
 0x3f9   : > { %s979_s1 = scalar_lea.sflag [#allocation7], %s978_s24 }
 0x3fa   : > { %p1153_p6 = pneg %p1152_p4 }
 0x3fc   : > { %1411 = dma.done.wait (%p1153_p6), %s979_s1, 256  }
 0x3fd   : > { %1413 = vsyncadd (%p1153_p6), %s979_s1, 4294967040  ;;  %s22_s23 = sadd.s32 1, %s1436_s23   ;;  %s1771_s18 = smov %s1420_s19 }
 0x3fe   : > { %p19_p8 = scmp.ge.s32.totalorder %s22_s23, 4   ;;  %s1772_s19 = smov %s1424_s20 }
 0x3ff   : > { %s1773_s20 = smov %s1577_s9  ;;  %s1774_s21 = smov %s1432_s22 }
 0x400   : > { %s1775_s22 = smov %s1777_s17  ;;  %21 = sbr.rel (!%p19_p8) target bundleno = 10 (0xa), region = 110 }
 0x405   :  { %985 = vsyncpa [#allocation6], 1 }
 0x406   :  { %987 = vsyncpa [#allocation6 + $0x1], 1 }
 0x407   :  { %988 = vsyncpa [#allocation9], 1 }
 0x408   :  { %989 = vsyncpa [#allocation7], 1 }
 0x409   :  { %991 = vsyncpa [#allocation7 + $0x1], 1 }

</bundles_post_ra>
